<compile_context>
chip_gen: v7x
topology: tpu7x:2x2x1
jax: 0.10.0
libtpu: 0.0.40
codegen_flags: <defaults>
</compile_context>

<pallas_src>
import jax
import jax.numpy as jnp
from jax.experimental import pallas as pl
from jax.experimental.pallas import tpu as pltpu


def _round_up(x, m):
    return ((x + m - 1) // m) * m


def _vmem_capacity_bytes():
    """Per-TensorCore VMEM capacity; conservative 64 MiB (v7x) fallback."""
    try:
        return int(pltpu.get_tpu_info().vmem_capacity_bytes)
    except Exception:
        return 64 << 20


# --------------------------------------------------------------------------- kernels


def _ffn_resident_kernel(x_ref, w1_ref, b1_ref, w2_ref, b2_ref, o_ref):
    """Weights resident in VMEM; 1-D grid over token tiles, single pass per tile."""
    x = x_ref[...].astype(jnp.bfloat16)
    h = jnp.dot(x, w1_ref[...], preferred_element_type=jnp.float32)
    h = jnp.maximum(h + b1_ref[...], 0.0)
    o = jnp.dot(h.astype(jnp.bfloat16), w2_ref[...], preferred_element_type=jnp.float32)
    o_ref[...] = o + b2_ref[...]


def _ffn_stream_kernel(x_ref, w1_ref, b1_ref, w2_ref, b2_ref, o_ref):
    """Weights streamed over the hidden-reduction grid axis (last, 'arbitrary')."""
    k = pl.program_id(1)

    @pl.when(k == 0)
    def _():
        # Fold b2 into the accumulator init (removes the old last-step epilogue RMW).
        o_ref[...] = jnp.broadcast_to(b2_ref[...], o_ref.shape)

    x = x_ref[...].astype(jnp.bfloat16)
    h = jnp.dot(x, w1_ref[...], preferred_element_type=jnp.float32)
    h = jnp.maximum(h + b1_ref[...], 0.0)
    o_ref[...] += jnp.dot(
        h.astype(jnp.bfloat16), w2_ref[...], preferred_element_type=jnp.float32
    )


# --------------------------------------------------------------------------- wrapper


def prepare_ffn_params(w1, b1, w2, b2):
    """One-time pad + bf16 cast of the weights (cache the result across calls)."""
    d_model, hidden = w1.shape
    d_pad = _round_up(max(d_model, 128), 128)
    w1p = (
        jnp.zeros((d_pad, hidden), jnp.bfloat16)
        .at[:d_model, :]
        .set(w1.astype(jnp.bfloat16))
    )
    w2p = (
        jnp.zeros((hidden, d_pad), jnp.bfloat16)
        .at[:, :d_model]
        .set(w2.astype(jnp.bfloat16))
    )
    b1_2d = b1.astype(jnp.float32).reshape(1, hidden)
    b2_2d = (
        jnp.zeros((1, d_pad), jnp.float32).at[0, :d_model].set(b2.astype(jnp.float32))
    )
    return dict(
        w1=w1p, b1=b1_2d, w2=w2p, b2=b2_2d,
        d_model=d_model, hidden=hidden, d_pad=d_pad,
    )


def feed_forward(x, w1=None, b1=None, w2=None, b2=None, *, params=None, tm=None, tile_h=None):
    """x: (batch, seq, d_model) f32.  Either pass raw (w1,b1,w2,b2) or prepared params."""
    if params is None:
        params = prepare_ffn_params(w1, b1, w2, b2)

    batch, seq, d_model = x.shape
    assert d_model == params["d_model"]
    hidden, d_pad = params["hidden"], params["d_pad"]
    m = batch * seq

    vmem_bytes = _vmem_capacity_bytes()
    vmem_cap = max(vmem_bytes - (16 << 20), 32 << 20)  # headroom for compiler scratch
    big_vmem = vmem_bytes >= (96 << 20)                # v5e/v6e-class (128 MiB)

    # ---- token tile: arithmetic intensity per weight byte == tm (streaming case) ----
    if tm is None:
        if m >= 512 and big_vmem:
            tm = 512
        elif m >= 256:
            tm = 256
        else:
            tm = min(_round_up(m, 16), 256)  # bf16 packs 16 rows per sublane group
    m_pad = _round_up(m, tm)

    # ---- x: skip the wrapper pad/cast pass when no padding is needed ----
    need_pad_x = (d_pad != d_model) or (m_pad != m)
    if need_pad_x:
        x2d = (
            jnp.zeros((m_pad, d_pad), jnp.bfloat16)
            .at[:m, :d_model]
            .set(x.reshape(m, d_model).astype(jnp.bfloat16))
        )
        x_bytes = 2
    else:
        x2d = x.reshape(m, d_model)  # streamed at native dtype, cast to bf16 in-kernel
        x_bytes = x2d.dtype.itemsize

    # ---- resident-weights feasibility (includes double-buffered blocks + h temps) ----
    resident_need = (
        2 * tm * d_pad * x_bytes                     # x tile, 2-deep
        + 2 * tm * d_pad * 4                         # f32 output tile, 2-deep
        + 2 * (d_pad * hidden + hidden * d_pad) * 2  # bf16 W1 + W2, 2 buffers each
        + 2 * (hidden + d_pad) * 4                   # biases
        + tm * hidden * (4 + 2)                      # f32 h + its bf16 copy
    )
    use_resident = (tile_h is None) and (int(1.3 * resident_need) <= vmem_cap)

    if use_resident:
        out2d = pl.pallas_call(
            _ffn_resident_kernel,
            out_shape=jax.ShapeDtypeStruct((m_pad, d_pad), jnp.float32),
            grid_spec=pltpu.PrefetchScalarGridSpec(
                num_scalar_prefetch=0,
                grid=(m_pad // tm,),
                in_specs=[
                    pl.BlockSpec((tm, d_pad), lambda i: (i, 0)),       # x token tile
                    pl.BlockSpec((d_pad, hidden), lambda i: (0, 0)),   # W1 (resident)
                    pl.BlockSpec((1, hidden), lambda i: (0, 0)),       # b1
                    pl.BlockSpec((hidden, d_pad), lambda i: (0, 0)),   # W2 (resident)
                    pl.BlockSpec((1, d_pad), lambda i: (0, 0)),        # b2
                ],
                out_specs=pl.BlockSpec((tm, d_pad), lambda i: (i, 0)),
            ),
            compiler_params=pltpu.CompilerParams(
                # TODO(synk): on v7x, pltpu.CORE_PARALLEL on the M axis would shard token
                # tiles across both TensorCores; "parallel" is the portable choice here.
                dimension_semantics=("parallel",),
                vmem_limit_bytes=min(max(int(1.3 * resident_need), 32 << 20), vmem_cap),
            ),
        )(x2d, params["w1"], params["b1"], params["w2"], params["b2"])
    else:
        # ---- streaming fallback: hidden-reduction axis last ("arbitrary") ----
        if tile_h is None:
            tile_h = 512 if hidden % 512 == 0 else (256 if hidden % 256 == 0 else 128)
        assert hidden % tile_h == 0

        wbuf = 3 if big_vmem else 2  # deeper weight pipeline only where VMEM allows
        stream_need = (
            2 * tm * d_pad * x_bytes
            + 2 * tm * d_pad * 4
            + wbuf * (d_pad * tile_h + tile_h * d_pad) * 2
            + 2 * (tile_h + d_pad) * 4
            + tm * tile_h * (4 + 2)
        )
        vmem_limit = min(max(int(1.3 * stream_need), 32 << 20), vmem_cap)
        w_kw = dict(pipeline_mode=pl.Buffered(wbuf)) if wbuf != 2 else {}

        out2d = pl.pallas_call(
            _ffn_stream_kernel,
            out_shape=jax.ShapeDtypeStruct((m_pad, d_pad), jnp.float32),
            grid_spec=pltpu.PrefetchScalarGridSpec(
                num_scalar_prefetch=0,
                grid=(m_pad // tm, hidden // tile_h),
                in_specs=[
                    pl.BlockSpec((tm, d_pad), lambda i, k: (i, 0)),            # x tile
                    pl.BlockSpec((d_pad, tile_h), lambda i, k: (0, k), **w_kw),  # W1 col tile
                    pl.BlockSpec((1, tile_h), lambda i, k: (0, k)),            # b1 tile
                    pl.BlockSpec((tile_h, d_pad), lambda i, k: (k, 0), **w_kw),  # W2 row tile
                    pl.BlockSpec((1, d_pad), lambda i, k: (0, 0)),             # b2
                ],
                out_specs=pl.BlockSpec((tm, d_pad), lambda i, k: (i, 0)),      # resident acc
            ),
            compiler_params=pltpu.CompilerParams(
                dimension_semantics=("parallel", "arbitrary"),
                vmem_limit_bytes=vmem_limit,
            ),
        )(x2d, params["w1"], params["b1"], params["w2"], params["b2"])

    return out2d[:m, :d_model].reshape(batch, seq, d_model)


# --------------------------------------------------------------------------- main


if __name__ == "__main__":
    # Small shapes consistent with the module: (batch, seq, d_model), hidden fixed at 2048.
    batch, seq, d_model, hidden = 2, 8, 32, 2048

    key = jax.random.PRNGKey(0)
    kx, kw1, kb1, kw2, kb2 = jax.random.split(key, 5)

    x = jax.random.normal(kx, (batch, seq, d_model), dtype=jnp.float32)

    # Weights stored pre-transposed to (in, out) so the kernel computes x @ W.
    w1 = jax.random.normal(kw1, (d_model, hidden), dtype=jnp.float32) * 0.02
    b1 = jax.random.normal(kb1, (hidden,), dtype=jnp.float32) * 0.02
    w2 = jax.random.normal(kw2, (hidden, d_model), dtype=jnp.float32) * 0.02
    b2 = jax.random.normal(kb2, (d_model,), dtype=jnp.float32) * 0.02

    params = prepare_ffn_params(w1, b1, w2, b2)  # one-time pad/cast (cache in real use)
    out = feed_forward(x, params=params)
    out = jax.block_until_ready(out)
    assert out.shape == (batch, seq, d_model)

    # Tight check vs. the kernel's bf16-input / f32-accumulate math.
    m = batch * seq
    xb = x.reshape(m, d_model).astype(jnp.bfloat16)
    h_ref = jnp.maximum(
        jnp.dot(xb, w1.astype(jnp.bfloat16), preferred_element_type=jnp.float32) + b1,
        0.0,
    )
    ref_bf16 = (
        jnp.dot(
            h_ref.astype(jnp.bfloat16),
            w2.astype(jnp.bfloat16),
            preferred_element_type=jnp.float32,
        )
        + b2
    ).reshape(batch, seq, d_model)
    assert jnp.allclose(out, ref_bf16, atol=1e-3, rtol=1e-3), "mismatch vs bf16 reference"

    # Loose check vs. the original module's full-f32 math.
    ref_f32 = jnp.maximum(x @ w1 + b1, 0.0) @ w2 + b2
    assert jnp.allclose(out, ref_f32, atol=1e-2, rtol=1e-1), "mismatch vs f32 reference"

    print("KERNEL_OK")
</pallas_src>

<mosaic_0001>
module attributes {stable_mosaic.version = 11 : i64} {
  func.func @_ffn_resident_kernel(%arg0: i32, %arg1: memref<16x128xbf16, #tpu.memory_space<vmem>>, %arg2: memref<128x2048xbf16, #tpu.memory_space<vmem>>, %arg3: memref<1x2048xf32, #tpu.memory_space<vmem>>, %arg4: memref<2048x128xbf16, #tpu.memory_space<vmem>>, %arg5: memref<1x128xf32, #tpu.memory_space<vmem>>, %arg6: memref<16x128xf32, #tpu.memory_space<vmem>>) attributes {dimension_semantics = [#tpu.dimension_semantics<parallel>], iteration_bounds = array<i64: 1>, scalar_prefetch = 0 : i64, scratch_operands = 0 : i64, tpu.core_type = #tpu.core_type<tc>, window_params = [{transform_indices = @transform_0, window_bounds = array<i64: 16, 128>}, {pipeline_mode = #tpu.pipeline_mode<synchronous>, transform_indices = @transform_1, window_bounds = array<i64: 128, 2048>}, {pipeline_mode = #tpu.pipeline_mode<synchronous>, transform_indices = @transform_2, window_bounds = array<i64: 1, 2048>}, {pipeline_mode = #tpu.pipeline_mode<synchronous>, transform_indices = @transform_3, window_bounds = array<i64: 2048, 128>}, {pipeline_mode = #tpu.pipeline_mode<synchronous>, transform_indices = @transform_4, window_bounds = array<i64: 1, 128>}, {transform_indices = @transform_5, window_bounds = array<i64: 16, 128>}]} {
    %c0 = arith.constant 0 : index
    %c0_0 = arith.constant 0 : index
    %0 = vector.load %arg1[%c0, %c0_0] : memref<16x128xbf16, #tpu.memory_space<vmem>>, vector<16x128xbf16>
    %c0_1 = arith.constant 0 : index
    %c0_2 = arith.constant 0 : index
    %1 = vector.load %arg2[%c0_1, %c0_2] : memref<128x2048xbf16, #tpu.memory_space<vmem>>, vector<128x2048xbf16>
    %cst = arith.constant dense<0.000000e+00> : vector<16x2048xf32>
    %2 = tpu.matmul %0, %1, %cst {dimension_numbers = #tpu.dot_dimension_numbers<[1], [0], [0], [1], [0, 0, 1, 1], [], []>} : vector<16x128xbf16>, vector<128x2048xbf16>, vector<16x2048xf32> -> vector<16x2048xf32>
    %c0_3 = arith.constant 0 : index
    %c0_4 = arith.constant 0 : index
    %3 = vector.load %arg3[%c0_3, %c0_4] : memref<1x2048xf32, #tpu.memory_space<vmem>>, vector<1x2048xf32>
    %4 = vector.broadcast %3 : vector<1x2048xf32> to vector<16x2048xf32>
    %5 = arith.addf %2, %4 : vector<16x2048xf32>
    %cst_5 = arith.constant 0.000000e+00 : f32
    %6 = vector.broadcast %cst_5 : f32 to vector<16x2048xf32>
    %7 = arith.maximumf %5, %6 : vector<16x2048xf32>
    %8 = arith.truncf %7 : vector<16x2048xf32> to vector<16x2048xbf16>
    %c0_6 = arith.constant 0 : index
    %c0_7 = arith.constant 0 : index
    %9 = vector.load %arg4[%c0_6, %c0_7] : memref<2048x128xbf16, #tpu.memory_space<vmem>>, vector<2048x128xbf16>
    %cst_8 = arith.constant dense<0.000000e+00> : vector<16x128xf32>
    %10 = tpu.matmul %8, %9, %cst_8 {dimension_numbers = #tpu.dot_dimension_numbers<[1], [0], [0], [1], [0, 0, 1, 1], [], []>} : vector<16x2048xbf16>, vector<2048x128xbf16>, vector<16x128xf32> -> vector<16x128xf32>
    %c0_9 = arith.constant 0 : index
    %c0_10 = arith.constant 0 : index
    %11 = vector.load %arg5[%c0_9, %c0_10] : memref<1x128xf32, #tpu.memory_space<vmem>>, vector<1x128xf32>
    %12 = vector.broadcast %11 : vector<1x128xf32> to vector<16x128xf32>
    %13 = arith.addf %10, %12 : vector<16x128xf32>
    %c0_11 = arith.constant 0 : index
    %c0_12 = arith.constant 0 : index
    %14 = vector.load %arg6[%c0_11, %c0_12] : memref<16x128xf32, #tpu.memory_space<vmem>>, vector<16x128xf32>
    tpu.vector_store %arg6[%c0_11, %c0_12], %13 {strides = array<i32>} : memref<16x128xf32, #tpu.memory_space<vmem>>, vector<16x128xf32>,
    return
  }
  func.func @transform_0(%arg0: i32) -> (i32, i32) {
    %c0_i32 = arith.constant 0 : i32
    %c0_i32_0 = arith.constant 0 : i32
    return %arg0, %c0_i32 : i32, i32
  }
  func.func @transform_1(%arg0: i32) -> (i32, i32) {
    %c0_i32 = arith.constant 0 : i32
    %c0_i32_0 = arith.constant 0 : i32
    %c0_i32_1 = arith.constant 0 : i32
    return %c0_i32, %c0_i32_0 : i32, i32
  }
  func.func @transform_2(%arg0: i32) -> (i32, i32) {
    %c0_i32 = arith.constant 0 : i32
    %c0_i32_0 = arith.constant 0 : i32
    %c0_i32_1 = arith.constant 0 : i32
    return %c0_i32, %c0_i32_0 : i32, i32
  }
  func.func @transform_3(%arg0: i32) -> (i32, i32) {
    %c0_i32 = arith.constant 0 : i32
    %c0_i32_0 = arith.constant 0 : i32
    %c0_i32_1 = arith.constant 0 : i32
    return %c0_i32, %c0_i32_0 : i32, i32
  }
  func.func @transform_4(%arg0: i32) -> (i32, i32) {
    %c0_i32 = arith.constant 0 : i32
    %c0_i32_0 = arith.constant 0 : i32
    %c0_i32_1 = arith.constant 0 : i32
    return %c0_i32, %c0_i32_0 : i32, i32
  }
  func.func @transform_5(%arg0: i32) -> (i32, i32) {
    %c0_i32 = arith.constant 0 : i32
    %c0_i32_0 = arith.constant 0 : i32
    return %arg0, %c0_i32 : i32, i32
  }
}

</mosaic_0001>

<bundles_post_ra>
// kernel: tpu_custom_call.1
= control target key start
LH: loop header
LB: loop body
LE: loop exit
PB: predicated region body
PF: predicated region fallthrough
CT: control target
= control target key end

     0   :  { %10 = vsyncpa [#allocation3], 0  ;;  %s3589_s0 = inlined_call_operand.hbm [shape: bf16[16,128], index: 0, kind: input, shape index: {}]   ;;  %s3590_s1 = inlined_call_operand.hbm [shape: bf16[128,2048], index: 1, kind: input, shape index: {}]   ;;  %s3591_s2 = inlined_call_operand.hbm [shape: f32[1,2048], index: 2, kind: input, shape index: {}]   ;;  %s3592_s3 = inlined_call_operand.hbm [shape: bf16[2048,128], index: 3, kind: input, shape index: {}]   ;;  %s3593_s4 = inlined_call_operand.vmem [shape: f32[1,128], index: 4, kind: input, shape index: {}]   ;;  %s3594_s5 = inlined_call_operand.hbm [shape: f32[16,128], index: 5, kind: output, shape index: {}]  }
   0x1   :  { %11 = vsyncpa [#allocation6], 0 }
   0x2   :  { %12 = vsyncpa [#allocation9], 0 }
   0x3   :  { %13 = vsyncpa [#allocation4], 0  ;;  %s3400_s18 = smov [#allocation5]   ;;  %s3282_s22 = scalar_lea.hbm %s3590_s1, 16384 }
   0x4   :  { %s31_s19 = sshll.u32 %s3400_s18, 4  ;;  %p3283_p0 = scmp.ne.s32.totalorder %s3590_s1, %s3282_s22  ;;  %s32_s19 = int_to_ptr.vmem [resolvable:$true] %s31_s19 }
   0x5   :  { %p3286_p1 = scmp.lt.u32.totalorder %s3282_s22, %s3590_s1 }
   0x7   :  { %p3288_p2 = pnand %p3286_p1, %p3283_p0 }
   0x9   :  { %3291 = shalt.err (!%p3288_p2)
}
   0xa   :  { %s3292_s27 = scalar_lea.vmem %s32_s19, 16384  ;;  %p3297_p4 = scmp.lt.s32.totalorder %s32_s19, %s32_s19 }
   0xb   :  { %p3293_p3 = scmp.ne.s32.totalorder %s32_s19, %s3292_s27  ;;  %p3298_p5 = scmp.lt.s32.totalorder %s3292_s27, %s3292_s27 }
   0xd   :  { %p3299_p6 = por %p3298_p5, %p3297_p4 }
   0xf   :  { %p3300_p7 = pnand %p3299_p6, %p3293_p3 }
  0x11   :  { %3303 = shalt.err (!%p3300_p7)
}
  0x12   :  { %s3401_s28 = smov 1024   ;;  %s3402_s29 = smov 64  }
  0x13   :  { %37 = dma.hbm_to_vmem [thread:$0]  %s3590_s1, 16384, %s32_s19, [#allocation6], %s3401_s28, %s3401_s28, %s3402_s29  }
  0x14   :  { %s3403_s7 = smov [#allocation2]   ;;  %s3304_s11 = scalar_lea.hbm %s3589_s0, 128 }
  0x15   :  { %s19_s8 = sshll.u32 %s3403_s7, 4  ;;  %p3305_p8 = scmp.ne.s32.totalorder %s3589_s0, %s3304_s11  ;;  %s20_s8 = int_to_ptr.vmem [resolvable:$true] %s19_s8 }
  0x16   :  { %p3308_p9 = scmp.lt.u32.totalorder %s3304_s11, %s3589_s0 }
  0x18   :  { %p3310_p10 = pnand %p3308_p9, %p3305_p8 }
  0x1a   :  { %3313 = shalt.err (!%p3310_p10)
}
  0x1b   :  { %s3314_s16 = scalar_lea.vmem %s20_s8, 128  ;;  %p3319_p12 = scmp.lt.s32.totalorder %s20_s8, %s20_s8 }
  0x1c   :  { %p3315_p11 = scmp.ne.s32.totalorder %s20_s8, %s3314_s16  ;;  %p3320_p13 = scmp.lt.s32.totalorder %s3314_s16, %s3314_s16 }
  0x1e   :  { %p3321_p0 = por %p3320_p13, %p3319_p12 }
  0x20   :  { %p3322_p1 = pnand %p3321_p0, %p3315_p11 }
  0x22   :  { %3325 = shalt.err (!%p3322_p1)
}
  0x23   :  { %s3404_s1 = smov 4   ;;  %s3405_s19 = smov [#allocation7]  }
  0x24   :  { %25 = dma.hbm_to_vmem [thread:$0]  %s3589_s0, 128, %s20_s8, [#allocation3], %s3402_s29, %s3402_s29, %s3404_s1  }
  0x25   :  { %s44_s20 = sshll.u32 %s3405_s19, 4  ;;  %s3406_s21 = smov [#allocation8]   ;;  %s45_s20 = int_to_ptr.vmem [resolvable:$true] %s44_s20 }
  0x26   :  { %s53_s22 = sshll.u32 %s3406_s21, 4  ;;  %s3326_s25 = scalar_lea.hbm %s3591_s2, 256  ;;  %s54_s22 = int_to_ptr.vmem [resolvable:$true] %s53_s22 }
  0x27   :  { %p3327_p2 = scmp.ne.s32.totalorder %s3591_s2, %s3326_s25  ;;  %p3330_p3 = scmp.lt.u32.totalorder %s3326_s25, %s3591_s2 }
  0x29   :  { %p3332_p4 = pnand %p3330_p3, %p3327_p2 }
  0x2b   :  { %3335 = shalt.err (!%p3332_p4)
}
  0x2c   :  { %s3336_s0 = scalar_lea.vmem %s45_s20, 256  ;;  %p3341_p6 = scmp.lt.s32.totalorder %s45_s20, %s45_s20 }
  0x2d   :  { %p3337_p5 = scmp.ne.s32.totalorder %s45_s20, %s3336_s0  ;;  %p3342_p7 = scmp.lt.s32.totalorder %s3336_s0, %s3336_s0 }
  0x2f   :  { %p3343_p8 = por %p3342_p7, %p3341_p6 }
  0x31   :  { %p3344_p9 = pnand %p3343_p8, %p3337_p5 }
  0x33   :  { %3347 = shalt.err (!%p3344_p9)
}
  0x34   :  { %47 = dma.hbm_to_vmem [thread:$0]  %s3591_s2, 256, %s45_s20, [#allocation6]  }
  0x35   :  { %s3348_s10 = scalar_lea.hbm %s3592_s3, 16384 }
  0x36   :  { %p3349_p10 = scmp.ne.s32.totalorder %s3592_s3, %s3348_s10  ;;  %p3352_p11 = scmp.lt.u32.totalorder %s3348_s10, %s3592_s3 }
  0x38   :  { %p3354_p12 = pnand %p3352_p11, %p3349_p10 }
  0x3a   :  { %3357 = shalt.err (!%p3354_p12)
}
  0x3b   :  { %s3358_s15 = scalar_lea.vmem %s54_s22, 16384  ;;  %p3363_p0 = scmp.lt.s32.totalorder %s54_s22, %s54_s22 }
  0x3c   :  { %p3359_p13 = scmp.ne.s32.totalorder %s54_s22, %s3358_s15  ;;  %p3364_p1 = scmp.lt.s32.totalorder %s3358_s15, %s3358_s15 }
  0x3e   :  { %p3365_p2 = por %p3364_p1, %p3363_p0 }
  0x40   :  { %p3366_p3 = pnand %p3365_p2, %p3359_p13 }
  0x42   :  { %3369 = shalt.err (!%p3366_p3)
}
  0x43   :  { %59 = dma.hbm_to_vmem [thread:$0]  %s3592_s3, 16384, %s54_s22, [#allocation9], %s3402_s29, %s3402_s29, %s3404_s1  }
  0x44   :  { %3392 = dma.done.wait [#allocation3], 128  }
  0x45   :  { %3393 = vsyncadd [#allocation3], 4294967168 }
  0x46   :  { %3394 = dma.done.wait [#allocation6], 16640  }
  0x47   :  { %3395 = vsyncadd [#allocation6], 4294950656 }
  0x48   :  { %3396 = dma.done.wait [#allocation9], 16384  }
  0x49   :  { %3397 = vsyncadd [#allocation9], 4294950912  ;;  %v3407_v0 = vmov 0   ;;  %v77_v1 = vld [vmem:[#allocation5] sm:$0xff]  ;;  %v78_v3 = vld [vmem:[#allocation5 + $0x8] sm:$0xff] }
  0x4a   :  { %967 = vmatprep.mubr.bf16.mxu0 %v3407_v0  ;;  %1010 = vmatprep.mubr.bf16.mxu1 %v3407_v0  ;;  %v85_v2 = vld [vmem:[#allocation5 + $0x40] sm:$0xff]  ;;  %v86_v5 = vld [vmem:[#allocation5 + $0x48] sm:$0xff]  ;;  %v79_v63 = vld [vmem:[#allocation5 + $0x10] sm:$0xff] }
  0x4b   :  { %v2709_v4 = vcombine.high %v77_v1, %v85_v2  ;;  %v2708_v6 = vcombine.low %v77_v1, %v85_v2  ;;  %v93_v7 = vld [vmem:[#allocation5 + $0x80] sm:$0xff]  ;;  %v2711_v9 = vcombine.high %v78_v3, %v86_v5  ;;  %v2710_v10 = vcombine.low %v78_v3, %v86_v5  ;;  %v94_v12 = vld [vmem:[#allocation5 + $0x88] sm:$0xff]  ;;  %v87_v1 = vld [vmem:[#allocation5 + $0x50] sm:$0xff] }
  0x4c   :  { %v101_v8 = vld [vmem:[#allocation5 + $0xc0] sm:$0xff]  ;;  %v102_v13 = vld [vmem:[#allocation5 + $0xc8] sm:$0xff]  ;;  %v80_v2 = vld [vmem:[#allocation5 + $0x18] sm:$0xff] }
  0x4d   :  { %v2725_v11 = vcombine.high %v93_v7, %v101_v8  ;;  %v109_v14 = vld [vmem:[#allocation5 + $0x100] sm:$0xff]  ;;  %935 = vmatprep.subr.bf16.mxu0 %v2709_v4  ;;  %v2727_v15 = vcombine.high %v94_v12, %v102_v13  ;;  %v110_v17 = vld [vmem:[#allocation5 + $0x108] sm:$0xff]  ;;  %978 = vmatprep.subr.bf16.mxu1 %v2711_v9  ;;  %v2724_v19 = vcombine.low %v93_v7, %v101_v8  ;;  %v88_v3 = vld [vmem:[#allocation5 + $0x58] sm:$0xff] }
  0x4e   :  { %v117_v16 = vld [vmem:[#allocation5 + $0x140] sm:$0xff]  ;;  %v118_v18 = vld [vmem:[#allocation5 + $0x148] sm:$0xff]  ;;  %936 = vmatpush1.bf16.msra.mxu0 %v2708_v6  ;;  %979 = vmatpush1.bf16.msra.mxu1 %v2710_v10  ;;  %v2726_v20 = vcombine.low %v94_v12, %v102_v13  ;;  %v2713_v6 = vcombine.high %v79_v63, %v87_v1  ;;  %v2715_v7 = vcombine.high %v80_v2, %v88_v3  ;;  %v95_v8 = vld [vmem:[#allocation5 + $0x90] sm:$0xff] }
  0x4f   :  { %937 = vmatprep.subr.bf16.mxu0 %v2725_v11  ;;  %v2741_v21 = vcombine.high %v109_v14, %v117_v16  ;;  %980 = vmatprep.subr.bf16.mxu1 %v2727_v15  ;;  %v2743_v22 = vcombine.high %v110_v17, %v118_v18  ;;  %v125_v23 = vld [vmem:[#allocation5 + $0x180] sm:$0xff]  ;;  %v126_v25 = vld [vmem:[#allocation5 + $0x188] sm:$0xff]  ;;  %v2740_v27 = vcombine.low %v109_v14, %v117_v16  ;;  %v103_v9 = vld [vmem:[#allocation5 + $0xd0] sm:$0xff] }
  0x50   :  { %v133_v24 = vld [vmem:[#allocation5 + $0x1c0] sm:$0xff]  ;;  %v134_v26 = vld [vmem:[#allocation5 + $0x1c8] sm:$0xff]  ;;  %v2742_v28 = vcombine.low %v110_v17, %v118_v18  ;;  %v3498_v10 = vld [vmem:[#allocation2] sm:$0xff]   ;;  %v2712_v13 = vcombine.low %v79_v63, %v87_v1  ;;  %v2714_v14 = vcombine.low %v80_v2, %v88_v3  ;;  %v2729_v15 = vcombine.high %v95_v8, %v103_v9 }
  0x51   :  { %v2757_v29 = vcombine.high %v125_v23, %v133_v24  ;;  %v2759_v30 = vcombine.high %v126_v25, %v134_v26  ;;  %v141_v31 = vld [vmem:[#allocation5 + $0x200] sm:$0xff]  ;;  %v142_v33 = vld [vmem:[#allocation5 + $0x208] sm:$0xff]  ;;  %v2756_v35 = vcombine.low %v125_v23, %v133_v24  ;;  %v2758_v36 = vcombine.low %v126_v25, %v134_v26  ;;  %v96_v11 = vld [vmem:[#allocation5 + $0x98] sm:$0xff] }
  0x52   :  { %938 = vmatpush1.bf16.msra.mxu0 %v2724_v19  ;;  %981 = vmatpush1.bf16.msra.mxu1 %v2726_v20  ;;  %v149_v32 = vld [vmem:[#allocation5 + $0x240] sm:$0xff]  ;;  %v150_v34 = vld [vmem:[#allocation5 + $0x248] sm:$0xff]  ;;  %v104_v12 = vld [vmem:[#allocation5 + $0xd8] sm:$0xff] }
  0x53   :  { %939 = vmatprep.subr.bf16.mxu0 %v2741_v21  ;;  %982 = vmatprep.subr.bf16.mxu1 %v2743_v22  ;;  %v2773_v37 = vcombine.high %v141_v31, %v149_v32  ;;  %v2775_v38 = vcombine.high %v142_v33, %v150_v34  ;;  %v157_v39 = vld [vmem:[#allocation5 + $0x280] sm:$0xff]  ;;  %v158_v41 = vld [vmem:[#allocation5 + $0x288] sm:$0xff]  ;;  %v2772_v43 = vcombine.low %v141_v31, %v149_v32  ;;  %v111_v17 = vld [vmem:[#allocation5 + $0x110] sm:$0xff] }
  0x54   :  { %v165_v40 = vld [vmem:[#allocation5 + $0x2c0] sm:$0xff]  ;;  %v166_v42 = vld [vmem:[#allocation5 + $0x2c8] sm:$0xff]  ;;  %v2774_v44 = vcombine.low %v142_v33, %v150_v34  ;;  %v2731_v16 = vcombine.high %v96_v11, %v104_v12  ;;  %v119_v18 = vld [vmem:[#allocation5 + $0x150] sm:$0xff]  ;;  %v2728_v21 = vcombine.low %v95_v8, %v103_v9  ;;  %v2730_v22 = vcombine.low %v96_v11, %v104_v12 }
  0x55   :  { %v2789_v45 = vcombine.high %v157_v39, %v165_v40  ;;  %v2791_v46 = vcombine.high %v158_v41, %v166_v42  ;;  %v173_v47 = vld [vmem:[#allocation5 + $0x300] sm:$0xff]  ;;  %v174_v49 = vld [vmem:[#allocation5 + $0x308] sm:$0xff]  ;;  %v2788_v51 = vcombine.low %v157_v39, %v165_v40  ;;  %v2790_v52 = vcombine.low %v158_v41, %v166_v42  ;;  %v112_v19 = vld [vmem:[#allocation5 + $0x118] sm:$0xff] }
  0x56   :  { %940 = vmatpush1.bf16.msra.mxu0 %v2740_v27  ;;  %983 = vmatpush1.bf16.msra.mxu1 %v2742_v28  ;;  %v181_v48 = vld [vmem:[#allocation5 + $0x340] sm:$0xff]  ;;  %v182_v50 = vld [vmem:[#allocation5 + $0x348] sm:$0xff]  ;;  %v120_v20 = vld [vmem:[#allocation5 + $0x158] sm:$0xff]  ;;  %v2745_v23 = vcombine.high %v111_v17, %v119_v18 }
  0x57   :  { %941 = vmatprep.subr.bf16.mxu0 %v2757_v29  ;;  %984 = vmatprep.subr.bf16.mxu1 %v2759_v30  ;;  %v2805_v53 = vcombine.high %v173_v47, %v181_v48  ;;  %v2807_v54 = vcombine.high %v174_v49, %v182_v50  ;;  %v189_v55 = vld [vmem:[#allocation5 + $0x380] sm:$0xff]  ;;  %v190_v57 = vld [vmem:[#allocation5 + $0x388] sm:$0xff]  ;;  %v2804_v59 = vcombine.low %v173_v47, %v181_v48  ;;  %v127_v25 = vld [vmem:[#allocation5 + $0x190] sm:$0xff] }
  0x58   :  { %v197_v56 = vld [vmem:[#allocation5 + $0x3c0] sm:$0xff]  ;;  %v198_v58 = vld [vmem:[#allocation5 + $0x3c8] sm:$0xff]  ;;  %v2806_v60 = vcombine.low %v174_v49, %v182_v50  ;;  %v2747_v24 = vcombine.high %v112_v19, %v120_v20  ;;  %v135_v26 = vld [vmem:[#allocation5 + $0x1d0] sm:$0xff]  ;;  %v2744_v29 = vcombine.low %v111_v17, %v119_v18  ;;  %v2746_v30 = vcombine.low %v112_v19, %v120_v20 }
  0x59   :  { %v2821_v61 = vcombine.high %v189_v55, %v197_v56  ;;  %v2823_v62 = vcombine.high %v190_v57, %v198_v58  ;;  %v2820_v4 = vcombine.low %v189_v55, %v197_v56  ;;  %v2822_v5 = vcombine.low %v190_v57, %v198_v58  ;;  %v128_v27 = vld [vmem:[#allocation5 + $0x198] sm:$0xff]  ;;  %v143_v33 = vld [vmem:[#allocation5 + $0x210] sm:$0xff]  ;;  %v89_v2 = vld [vmem:[#allocation5 + $0x60] sm:$0xff] }
  0x5a   :  { %942 = vmatpush1.bf16.msra.mxu0 %v2756_v35  ;;  %985 = vmatpush1.bf16.msra.mxu1 %v2758_v36  ;;  %v136_v28 = vld [vmem:[#allocation5 + $0x1d8] sm:$0xff]  ;;  %v2761_v31 = vcombine.high %v127_v25, %v135_v26  ;;  %v151_v34 = vld [vmem:[#allocation5 + $0x250] sm:$0xff]  ;;  %v105_v11 = vld [vmem:[#allocation5 + $0xe0] sm:$0xff] }
  0x5b   :  { %943 = vmatprep.subr.bf16.mxu0 %v2773_v37  ;;  %986 = vmatprep.subr.bf16.mxu1 %v2775_v38  ;;  %v2763_v32 = vcombine.high %v128_v27, %v136_v28  ;;  %v144_v35 = vld [vmem:[#allocation5 + $0x218] sm:$0xff]  ;;  %v2760_v37 = vcombine.low %v127_v25, %v135_v26  ;;  %v159_v38 = vld [vmem:[#allocation5 + $0x290] sm:$0xff]  ;;  %v2762_v39 = vcombine.low %v128_v27, %v136_v28  ;;  %v121_v17 = vld [vmem:[#allocation5 + $0x160] sm:$0xff] }
  0x5c   :  { %v152_v36 = vld [vmem:[#allocation5 + $0x258] sm:$0xff]  ;;  %v2777_v40 = vcombine.high %v143_v33, %v151_v34  ;;  %v167_v41 = vld [vmem:[#allocation5 + $0x2d0] sm:$0xff]  ;;  %v114_v20 = vld [vmem:[#allocation5 + $0x128] sm:$0xff] }
  0x5d   :  { %v2779_v42 = vcombine.high %v144_v35, %v152_v36  ;;  %v2778_v47 = vcombine.low %v144_v35, %v152_v36  ;;  %v2793_v48 = vcombine.high %v159_v38, %v167_v41  ;;  %v183_v49 = vld [vmem:[#allocation5 + $0x350] sm:$0xff]  ;;  %v137_v25 = vld [vmem:[#allocation5 + $0x1e0] sm:$0xff]  ;;  %v130_v28 = vld [vmem:[#allocation5 + $0x1a8] sm:$0xff] }
  0x5e   :  { %944 = vmatpush1.bf16.msra.mxu0 %v2772_v43  ;;  %987 = vmatpush1.bf16.msra.mxu1 %v2774_v44  ;;  %v160_v43 = vld [vmem:[#allocation5 + $0x298] sm:$0xff]  ;;  %v199_v57 = vld [vmem:[#allocation5 + $0x3d0] sm:$0xff]  ;;  %v146_v36 = vld [vmem:[#allocation5 + $0x228] sm:$0xff] }
  0x5f   :  { %945 = vmatprep.subr.bf16.mxu0 %v2789_v45  ;;  %988 = vmatprep.subr.bf16.mxu1 %v2791_v46  ;;  %v168_v44 = vld [vmem:[#allocation5 + $0x2d8] sm:$0xff]  ;;  %v2776_v45 = vcombine.low %v143_v33, %v151_v34  ;;  %v175_v46 = vld [vmem:[#allocation5 + $0x310] sm:$0xff]  ;;  %v153_v33 = vld [vmem:[#allocation5 + $0x260] sm:$0xff] }
  0x60   :  { %v2795_v50 = vcombine.high %v160_v43, %v168_v44  ;;  %v2794_v55 = vcombine.low %v160_v43, %v168_v44  ;;  %v2809_v56 = vcombine.high %v175_v46, %v183_v49  ;;  %v162_v44 = vld [vmem:[#allocation5 + $0x2a8] sm:$0xff] }
  0x62   :  { %946 = vmatpush1.bf16.msra.mxu0 %v2788_v51  ;;  %989 = vmatpush1.bf16.msra.mxu1 %v2790_v52  ;;  %v176_v51 = vld [vmem:[#allocation5 + $0x318] sm:$0xff] }
  0x63   :  { %947 = vmatprep.subr.bf16.mxu0 %v2805_v53  ;;  %990 = vmatprep.subr.bf16.mxu1 %v2807_v54  ;;  %v184_v52 = vld [vmem:[#allocation5 + $0x358] sm:$0xff]  ;;  %v2792_v53 = vcombine.low %v159_v38, %v167_v41  ;;  %v191_v54 = vld [vmem:[#allocation5 + $0x390] sm:$0xff]  ;;  %v169_v41 = vld [vmem:[#allocation5 + $0x2e0] sm:$0xff] }
  0x64   :  { %v2811_v58 = vcombine.high %v176_v51, %v184_v52  ;;  %v2810_v63 = vcombine.low %v176_v51, %v184_v52  ;;  %v2825_v1 = vcombine.high %v191_v54, %v199_v57  ;;  %v178_v52 = vld [vmem:[#allocation5 + $0x328] sm:$0xff] }
  0x66   :  { %948 = vmatpush1.bf16.msra.mxu0 %v2804_v59  ;;  %991 = vmatpush1.bf16.msra.mxu1 %v2806_v60  ;;  %v192_v59 = vld [vmem:[#allocation5 + $0x398] sm:$0xff] }
  0x67   :  { %949 = vmatprep.subr.bf16.mxu0 %v2821_v61  ;;  %992 = vmatprep.subr.bf16.mxu1 %v2823_v62  ;;  %v200_v60 = vld [vmem:[#allocation5 + $0x3d8] sm:$0xff]  ;;  %v2808_v61 = vcombine.low %v175_v46, %v183_v49  ;;  %v81_v62 = vld [vmem:[#allocation5 + $0x20] sm:$0xff] }
  0x68   :  { %v2827_v3 = vcombine.high %v192_v59, %v200_v60  ;;  %v2826_v8 = vcombine.low %v192_v59, %v200_v60  ;;  %v2717_v9 = vcombine.high %v81_v62, %v89_v2  ;;  %v185_v49 = vld [vmem:[#allocation5 + $0x360] sm:$0xff]  ;;  %v194_v60 = vld [vmem:[#allocation5 + $0x3a8] sm:$0xff] }
  0x6a   :  { %950 = vmatpush1.bf16.msra.mxu0 %v2820_v4  ;;  %993 = vmatpush1.bf16.msra.mxu1 %v2822_v5  ;;  %v82_v4 = vld [vmem:[#allocation5 + $0x28] sm:$0xff] }
  0x6b   :  { %1021 = vmatprep.subr.bf16.mxu0 %v2713_v6  ;;  %1064 = vmatprep.subr.bf16.mxu1 %v2715_v7  ;;  %v90_v5 = vld [vmem:[#allocation5 + $0x68] sm:$0xff]  ;;  %v2824_v6 = vcombine.low %v191_v54, %v199_v57  ;;  %v97_v7 = vld [vmem:[#allocation5 + $0xa0] sm:$0xff] }
  0x6c   :  { %v2719_v12 = vcombine.high %v82_v4, %v90_v5  ;;  %v2718_v18 = vcombine.low %v82_v4, %v90_v5  ;;  %v2733_v19 = vcombine.high %v97_v7, %v105_v11  ;;  %v201_v57 = vld [vmem:[#allocation5 + $0x3e0] sm:$0xff]  ;;  %v84_v5 = vld [vmem:[#allocation5 + $0x38] sm:$0xff] }
  0x6d   :  { %968 = vmatmul.mubr.bf16.vlgmr.msra.gmra.mrb[0].mxu0 %v3498_v10  ;;  %1011 = vmatmul.mubr.bf16.vlgmr.msra.gmra.mrb[0].mxu1 %v3498_v10 }
  0x6e   :  { %1022 = vmatpush1.bf16.msra.mxu0 %v2712_v13  ;;  %1065 = vmatpush1.bf16.msra.mxu1 %v2714_v14  ;;  %v98_v13 = vld [vmem:[#allocation5 + $0xa8] sm:$0xff] }
  0x6f   :  { %1023 = vmatprep.subr.bf16.mxu0 %v2729_v15  ;;  %1066 = vmatprep.subr.bf16.mxu1 %v2731_v16  ;;  %v106_v14 = vld [vmem:[#allocation5 + $0xe8] sm:$0xff]  ;;  %v2716_v15 = vcombine.low %v81_v62, %v89_v2  ;;  %v113_v16 = vld [vmem:[#allocation5 + $0x120] sm:$0xff]  ;;  %v91_v2 = vld [vmem:[#allocation5 + $0x70] sm:$0xff] }
  0x70   :  { %1053 = vmatprep.mubr.bf16.mxu0 %v3407_v0  ;;  %1096 = vmatprep.mubr.bf16.mxu1 %v3407_v0  ;;  %v2734_v26 = vcombine.low %v98_v13, %v106_v14  ;;  %v2749_v27 = vcombine.high %v113_v16, %v121_v17 }
  0x72   :  { %1024 = vmatpush1.bf16.msra.mxu0 %v2728_v21  ;;  %1067 = vmatpush1.bf16.msra.mxu1 %v2730_v22  ;;  %v122_v21 = vld [vmem:[#allocation5 + $0x168] sm:$0xff]  ;;  %v2735_v22 = vcombine.high %v98_v13, %v106_v14  ;;  %v100_v14 = vld [vmem:[#allocation5 + $0xb8] sm:$0xff] }
  0x73   :  { %1025 = vmatprep.subr.bf16.mxu0 %v2745_v23  ;;  %1068 = vmatprep.subr.bf16.mxu1 %v2747_v24  ;;  %v2732_v23 = vcombine.low %v97_v7, %v105_v11  ;;  %v129_v24 = vld [vmem:[#allocation5 + $0x1a0] sm:$0xff]  ;;  %v2750_v34 = vcombine.low %v114_v20, %v122_v21  ;;  %v107_v11 = vld [vmem:[#allocation5 + $0xf0] sm:$0xff] }
  0x74   :  { %v2765_v35 = vcombine.high %v129_v24, %v137_v25 }
  0x76   :  { %1026 = vmatpush1.bf16.msra.mxu0 %v2744_v29  ;;  %1069 = vmatpush1.bf16.msra.mxu1 %v2746_v30  ;;  %v138_v29 = vld [vmem:[#allocation5 + $0x1e8] sm:$0xff]  ;;  %v2751_v30 = vcombine.high %v114_v20, %v122_v21 }
  0x77   :  { %1027 = vmatprep.subr.bf16.mxu0 %v2761_v31  ;;  %1070 = vmatprep.subr.bf16.mxu1 %v2763_v32  ;;  %v2748_v31 = vcombine.low %v113_v16, %v121_v17  ;;  %v145_v32 = vld [vmem:[#allocation5 + $0x220] sm:$0xff]  ;;  %v2767_v38 = vcombine.high %v130_v28, %v138_v29 }
  0x78   :  { %v2781_v43 = vcombine.high %v145_v32, %v153_v33 }
  0x7a   :  { %1028 = vmatpush1.bf16.msra.mxu0 %v2760_v37  ;;  %1071 = vmatpush1.bf16.msra.mxu1 %v2762_v39  ;;  %v154_v37 = vld [vmem:[#allocation5 + $0x268] sm:$0xff]  ;;  %v2764_v39 = vcombine.low %v129_v24, %v137_v25 }
  0x7b   :  { %1029 = vmatprep.subr.bf16.mxu0 %v2777_v40  ;;  %1072 = vmatprep.subr.bf16.mxu1 %v2779_v42  ;;  %v161_v40 = vld [vmem:[#allocation5 + $0x2a0] sm:$0xff]  ;;  %v2766_v42 = vcombine.low %v130_v28, %v138_v29  ;;  %v2783_v46 = vcombine.high %v146_v36, %v154_v37 }
  0x7c   :  { %v2797_v51 = vcombine.high %v161_v40, %v169_v41 }
  0x7e   :  { %1030 = vmatpush1.bf16.msra.mxu0 %v2776_v45  ;;  %1073 = vmatpush1.bf16.msra.mxu1 %v2778_v47  ;;  %v170_v45 = vld [vmem:[#allocation5 + $0x2e8] sm:$0xff]  ;;  %v2780_v47 = vcombine.low %v145_v32, %v153_v33 }
  0x7f   :  { %1031 = vmatprep.subr.bf16.mxu0 %v2793_v48  ;;  %1074 = vmatprep.subr.bf16.mxu1 %v2795_v50  ;;  %v177_v48 = vld [vmem:[#allocation5 + $0x320] sm:$0xff]  ;;  %v2782_v50 = vcombine.low %v146_v36, %v154_v37  ;;  %v2799_v54 = vcombine.high %v162_v44, %v170_v45  ;;  %v148_v37 = vld [vmem:[#allocation5 + $0x238] sm:$0xff] }
  0x80   :  { %v2813_v59 = vcombine.high %v177_v48, %v185_v49 }
  0x82   :  { %1032 = vmatpush1.bf16.msra.mxu0 %v2792_v53  ;;  %1075 = vmatpush1.bf16.msra.mxu1 %v2794_v55  ;;  %v186_v53 = vld [vmem:[#allocation5 + $0x368] sm:$0xff]  ;;  %v2796_v55 = vcombine.low %v161_v40, %v169_v41  ;;  %v163_v41 = vld [vmem:[#allocation5 + $0x2b0] sm:$0xff] }
  0x83   :  { %1033 = vmatprep.subr.bf16.mxu0 %v2809_v56  ;;  %1076 = vmatprep.subr.bf16.mxu1 %v2811_v58  ;;  %v193_v56 = vld [vmem:[#allocation5 + $0x3a0] sm:$0xff]  ;;  %v2798_v58 = vcombine.low %v162_v44, %v170_v45  ;;  %v2815_v62 = vcombine.high %v178_v52, %v186_v53  ;;  %v164_v44 = vld [vmem:[#allocation5 + $0x2b8] sm:$0xff] }
  0x84   :  { %v2829_v4 = vcombine.high %v193_v56, %v201_v57  ;;  %v172_v45 = vld [vmem:[#allocation5 + $0x2f8] sm:$0xff] }
  0x86   :  { %1034 = vmatpush1.bf16.msra.mxu0 %v2808_v61  ;;  %1077 = vmatpush1.bf16.msra.mxu1 %v2810_v63  ;;  %v202_v61 = vld [vmem:[#allocation5 + $0x3e8] sm:$0xff]  ;;  %v2812_v63 = vcombine.low %v177_v48, %v185_v49  ;;  %v179_v48 = vld [vmem:[#allocation5 + $0x330] sm:$0xff] }
  0x87   :  { %1035 = vmatprep.subr.bf16.mxu0 %v2825_v1  ;;  %1078 = vmatprep.subr.bf16.mxu1 %v2827_v3  ;;  %v83_v1 = vld [vmem:[#allocation5 + $0x30] sm:$0xff]  ;;  %v2814_v3 = vcombine.low %v178_v52, %v186_v53  ;;  %v2831_v7 = vcombine.high %v194_v60, %v202_v61  ;;  %v180_v52 = vld [vmem:[#allocation5 + $0x338] sm:$0xff] }
  0x88   :  { %v2721_v13 = vcombine.high %v83_v1, %v91_v2  ;;  %v2720_v17 = vcombine.low %v83_v1, %v91_v2  ;;  %v187_v49 = vld [vmem:[#allocation5 + $0x370] sm:$0xff]  ;;  %v188_v53 = vld [vmem:[#allocation5 + $0x378] sm:$0xff] }
  0x89   :  { %v2818_v1 = vcombine.low %v180_v52, %v188_v53 }
  0x8a   :  { %1036 = vmatpush1.bf16.msra.mxu0 %v2824_v6  ;;  %1079 = vmatpush1.bf16.msra.mxu1 %v2826_v8  ;;  %v92_v6 = vld [vmem:[#allocation5 + $0x78] sm:$0xff]  ;;  %v2828_v8 = vcombine.low %v193_v56, %v201_v57  ;;  %v195_v56 = vld [vmem:[#allocation5 + $0x3b0] sm:$0xff]  ;;  %v2802_v57 = vcombine.low %v164_v44, %v172_v45 }
  0x8b   :  { %1107 = vmatprep.subr.bf16.mxu0 %v2717_v9  ;;  %1150 = vmatprep.subr.bf16.mxu1 %v2719_v12  ;;  %v99_v9 = vld [vmem:[#allocation5 + $0xb0] sm:$0xff]  ;;  %v2830_v12 = vcombine.low %v194_v60, %v202_v61  ;;  %v2723_v16 = vcombine.high %v84_v5, %v92_v6  ;;  %v2722_v20 = vcombine.low %v84_v5, %v92_v6  ;;  %v196_v60 = vld [vmem:[#allocation5 + $0x3b8] sm:$0xff] }
  0x8c   :  { %v2737_v21 = vcombine.high %v99_v9, %v107_v11  ;;  %v2736_v25 = vcombine.low %v99_v9, %v107_v11  ;;  %v2819_v61 = vcombine.high %v180_v52, %v188_v53  ;;  %v3153_v6 = vld [vmem:[#allocation8 + $0x40] sm:$0xff]   ;;  %v3157_v11 = vld [vmem:[#allocation8 + $0x48] sm:$0xff]  }
  0x8d   :  { %1054 = vmatmul.mubr.bf16.vlgmr.msra.gmra.mrb[4].mxu0 %v3498_v10  ;;  %1097 = vmatmul.mubr.bf16.vlgmr.msra.gmra.mrb[4].mxu1 %v3498_v10  ;;  %v3156_v9 = vld [vmem:[#allocation8 + $0x80] sm:$0xff]  }
  0x8e   :  { %1108 = vmatpush1.bf16.msra.mxu0 %v2716_v15  ;;  %1151 = vmatpush1.bf16.msra.mxu1 %v2718_v18  ;;  %v108_v15 = vld [vmem:[#allocation5 + $0xf8] sm:$0xff]  ;;  %v115_v18 = vld [vmem:[#allocation5 + $0x130] sm:$0xff] }
  0x8f   :  { %1109 = vmatprep.subr.bf16.mxu0 %v2733_v19  ;;  %1152 = vmatprep.subr.bf16.mxu1 %v2735_v22  ;;  %v123_v19 = vld [vmem:[#allocation5 + $0x170] sm:$0xff]  ;;  %v116_v22 = vld [vmem:[#allocation5 + $0x138] sm:$0xff]  ;;  %v2739_v24 = vcombine.high %v100_v14, %v108_v15  ;;  %v2738_v28 = vcombine.low %v100_v14, %v108_v15 }
  0x90   :  { %1139 = vmatprep.mubr.bf16.mxu0 %v3407_v0  ;;  %1182 = vmatprep.mubr.bf16.mxu1 %v3407_v0  ;;  %v2753_v29 = vcombine.high %v115_v18, %v123_v19  ;;  %v2752_v33 = vcombine.low %v115_v18, %v123_v19  ;;  %v3159_v14 = vld [vmem:[#allocation8 + $0x8] sm:$0xff]   ;;  %v3163_v18 = vld [vmem:[#allocation8 + $0x10] sm:$0xff]  }
  0x91   :  { %v3160_v15 = vld [vmem:[#allocation8 + $0x88] sm:$0xff]   ;;  %v3164_v19 = vld [vmem:[#allocation8 + $0x90] sm:$0xff]  }
  0x92   :  { %1110 = vmatpush1.bf16.msra.mxu0 %v2732_v23  ;;  %1153 = vmatpush1.bf16.msra.mxu1 %v2734_v26  ;;  %v124_v23 = vld [vmem:[#allocation5 + $0x178] sm:$0xff]  ;;  %v131_v26 = vld [vmem:[#allocation5 + $0x1b0] sm:$0xff] }
  0x93   :  { %1111 = vmatprep.subr.bf16.mxu0 %v2749_v27  ;;  %1154 = vmatprep.subr.bf16.mxu1 %v2751_v30  ;;  %v139_v27 = vld [vmem:[#allocation5 + $0x1f0] sm:$0xff]  ;;  %v132_v30 = vld [vmem:[#allocation5 + $0x1b8] sm:$0xff]  ;;  %v2755_v32 = vcombine.high %v116_v22, %v124_v23 }
  0x94   :  { %v2769_v36 = vcombine.high %v131_v26, %v139_v27  ;;  %v2768_v40 = vcombine.low %v131_v26, %v139_v27  ;;  %v3171_v26 = vld [vmem:[#allocation8 + $0x20] sm:$0xff]  }
  0x95   :  { %v3172_v27 = vld [vmem:[#allocation8 + $0xa0] sm:$0xff]  }
  0x96   :  { %1112 = vmatpush1.bf16.msra.mxu0 %v2748_v31  ;;  %1155 = vmatpush1.bf16.msra.mxu1 %v2750_v34  ;;  %v140_v31 = vld [vmem:[#allocation5 + $0x1f8] sm:$0xff]  ;;  %v147_v34 = vld [vmem:[#allocation5 + $0x230] sm:$0xff] }
  0x97   :  { %1113 = vmatprep.subr.bf16.mxu0 %v2765_v35  ;;  %1156 = vmatprep.subr.bf16.mxu1 %v2767_v38  ;;  %v2754_v35 = vcombine.low %v116_v22, %v124_v23  ;;  %v156_v38 = vld [vmem:[#allocation5 + $0x278] sm:$0xff]  ;;  %v3167_v22 = vld [vmem:[#allocation8 + $0x18] sm:$0xff]  }
  0x98   :  { %v3168_v23 = vld [vmem:[#allocation8 + $0x98] sm:$0xff]  }
  0x9a   :  { %1114 = vmatpush1.bf16.msra.mxu0 %v2764_v39  ;;  %1157 = vmatpush1.bf16.msra.mxu1 %v2766_v42  ;;  %v2771_v39 = vcombine.high %v132_v30, %v140_v31  ;;  %v171_v42 = vld [vmem:[#allocation5 + $0x2f0] sm:$0xff] }
  0x9b   :  { %1115 = vmatprep.subr.bf16.mxu0 %v2781_v43  ;;  %1158 = vmatprep.subr.bf16.mxu1 %v2783_v46  ;;  %v2770_v43 = vcombine.low %v132_v30, %v140_v31  ;;  %v2787_v46 = vcombine.high %v148_v37, %v156_v38  ;;  %v3175_v30 = vld [vmem:[#allocation8 + $0x28] sm:$0xff]  }
  0x9c   :  { %v3176_v31 = vld [vmem:[#allocation8 + $0xa8] sm:$0xff]  }
  0x9e   :  { %1116 = vmatpush1.bf16.msra.mxu0 %v2780_v47  ;;  %1159 = vmatpush1.bf16.msra.mxu1 %v2782_v50  ;;  %v2786_v50 = vcombine.low %v148_v37, %v156_v38  ;;  %v3183_v37 = vld [vmem:[#allocation8 + $0x38] sm:$0xff]  }
  0x9f   :  { %1117 = vmatprep.subr.bf16.mxu0 %v2797_v51  ;;  %1160 = vmatprep.subr.bf16.mxu1 %v2799_v54  ;;  %v2801_v51 = vcombine.high %v163_v41, %v171_v42  ;;  %v2803_v54 = vcombine.high %v164_v44, %v172_v45  ;;  %v3184_v38 = vld [vmem:[#allocation8 + $0xb8] sm:$0xff]  }
  0xa2   :  { %1118 = vmatpush1.bf16.msra.mxu0 %v2796_v55  ;;  %1161 = vmatpush1.bf16.msra.mxu1 %v2798_v58  ;;  %v2800_v55 = vcombine.low %v163_v41, %v171_v42  ;;  %v2817_v58 = vcombine.high %v179_v48, %v187_v49  ;;  %v209_v41 = vlaneseq }
  0xa3   :  { %1119 = vmatprep.subr.bf16.mxu0 %v2813_v59  ;;  %1162 = vmatprep.subr.bf16.mxu1 %v2815_v62  ;;  %v203_v59 = vld [vmem:[#allocation5 + $0x3f0] sm:$0xff]  ;;  %v204_v62 = vld [vmem:[#allocation5 + $0x3f8] sm:$0xff] }
  0xa4   :  { %v2833_v2 = vcombine.high %v195_v56, %v203_v59  ;;  %v2834_v5 = vcombine.low %v196_v60, %v204_v62  ;;  %v3512_v42 = vshrl.u32 %v209_v41, 7 }
  0xa6   :  { %1120 = vmatpush1.bf16.msra.mxu0 %v2812_v63  ;;  %1163 = vmatpush1.bf16.msra.mxu1 %v2814_v3  ;;  %v2816_v63 = vcombine.low %v179_v48, %v187_v49  ;;  %v2835_v3 = vcombine.high %v196_v60, %v204_v62  ;;  %v219_v44 = vsub.s32 2, %v3512_v42  ;;  %v215_v45 = vsub.s32 1, %v3512_v42 }
  0xa7   :  { %1121 = vmatprep.subr.bf16.mxu0 %v2829_v4  ;;  %1164 = vmatprep.subr.bf16.mxu1 %v2831_v7  ;;  %v2832_v4 = vcombine.low %v195_v56, %v203_v59  ;;  %v3154_v7 = vld [vmem:[#allocation8 + $0xc0] sm:$0xff]  }
  0xaa   :  { %1122 = vmatpush1.bf16.msra.mxu0 %v2828_v8  ;;  %1165 = vmatpush1.bf16.msra.mxu1 %v2830_v12  ;;  %v3155_v8 = vld [vmem:[#allocation8] sm:$0xff]   ;;  %v3158_v12 = vld [vmem:[#allocation8 + $0xc8] sm:$0xff]  }
  0xab   :  { %1193 = vmatprep.subr.bf16.mxu0 %v2721_v13  ;;  %1236 = vmatprep.subr.bf16.mxu1 %v2723_v16  ;;  %v3281_v13 = vld [vmem:[#allocation2] sm:$0xff]   ;;  %v3161_v16 = vld [vmem:[#allocation8 + $0x50] sm:$0xff]  }
  0xad   :  { %1140 = vmatmul.mubr.bf16.vlgmr.msra.gmra.mrb[8].mxu0 %v3498_v10  ;;  %1183 = vmatmul.mubr.bf16.vlgmr.msra.gmra.mrb[8].mxu1 %v3498_v10  ;;  %v155_v10 = vld [vmem:[#allocation5 + $0x270] sm:$0xff] }
  0xae   :  { %1194 = vmatpush1.bf16.msra.mxu0 %v2720_v17  ;;  %1237 = vmatpush1.bf16.msra.mxu1 %v2722_v20  ;;  %v2784_v47 = vcombine.low %v147_v34, %v155_v10  ;;  %v3162_v17 = vld [vmem:[#allocation8 + $0xd0] sm:$0xff]   ;;  %v3165_v20 = vld [vmem:[#allocation8 + $0x58] sm:$0xff]  }
  0xaf   :  { %1195 = vmatprep.subr.bf16.mxu0 %v2737_v21  ;;  %1238 = vmatprep.subr.bf16.mxu1 %v2739_v24  ;;  %v3166_v21 = vld [vmem:[#allocation8 + $0xd8] sm:$0xff]   ;;  %v3169_v24 = vld [vmem:[#allocation8 + $0x60] sm:$0xff]  }
  0xb0   :  { %1225 = vmatprep.mubr.bf16.mxu0 %v3407_v0  ;;  %1268 = vmatprep.mubr.bf16.mxu1 %v3407_v0  ;;  %v2785_v0 = vcombine.high %v147_v34, %v155_v10  ;;  %v3179_v34 = vld [vmem:[#allocation8 + $0x30] sm:$0xff]  }
  0xb1   :  { %v3180_v10 = vld [vmem:[#allocation8 + $0xb0] sm:$0xff]  }
  0xb2   :  { %1196 = vmatpush1.bf16.msra.mxu0 %v2736_v25  ;;  %1239 = vmatpush1.bf16.msra.mxu1 %v2738_v28  ;;  %v3170_v25 = vld [vmem:[#allocation8 + $0xe0] sm:$0xff]   ;;  %v3173_v28 = vld [vmem:[#allocation8 + $0x68] sm:$0xff]  }
  0xb3   :  { %1197 = vmatprep.subr.bf16.mxu0 %v2753_v29  ;;  %1240 = vmatprep.subr.bf16.mxu1 %v2755_v32  ;;  %v3174_v29 = vld [vmem:[#allocation8 + $0xe8] sm:$0xff]   ;;  %v3177_v32 = vld [vmem:[#allocation8 + $0x70] sm:$0xff]  }
  0xb6   :  { %1198 = vmatpush1.bf16.msra.mxu0 %v2752_v33  ;;  %1241 = vmatpush1.bf16.msra.mxu1 %v2754_v35  ;;  %v3178_v33 = vld [vmem:[#allocation8 + $0xf0] sm:$0xff]   ;;  %v3181_v35 = vld [vmem:[#allocation8 + $0x78] sm:$0xff]  }
  0xb7   :  { %1199 = vmatprep.subr.bf16.mxu0 %v2769_v36  ;;  %1242 = vmatprep.subr.bf16.mxu1 %v2771_v39  ;;  %v3182_v36 = vld [vmem:[#allocation8 + $0xf8] sm:$0xff]   ;;  %v3185_v39 = vld [vmem:[#allocation8 + $0x140] sm:$0xff]  }
  0xba   :  { %1200 = vmatpush1.bf16.msra.mxu0 %v2768_v40  ;;  %1243 = vmatpush1.bf16.msra.mxu1 %v2770_v43  ;;  %v3186_v40 = vld [vmem:[#allocation8 + $0x1c0] sm:$0xff]   ;;  %v211_v43 = vsub.s32 0, %v3512_v42 }
  0xbb   :  { %1201 = vmatprep.subr.bf16.mxu0 %v2785_v0  ;;  %1244 = vmatprep.subr.bf16.mxu1 %v2787_v46  ;;  %v3515_v0 = vld [vmem:[#allocation7] sm:$0xff]  ;;  %v223_v46 = vsub.s32 3, %v3512_v42 }
  0xbc   :  { %v220_v48 = vrot.slane %v3515_v0, %v219_v44  ;;  %v216_v49 = vrot.slane %v3515_v0, %v215_v45 }
  0xbe   :  { %1202 = vmatpush1.bf16.msra.mxu0 %v2784_v47  ;;  %1245 = vmatpush1.bf16.msra.mxu1 %v2786_v50  ;;  %v212_v47 = vrot.slane %v3515_v0, %v211_v43  ;;  %v224_v50 = vrot.slane %v3515_v0, %v223_v46 }
  0xbf   :  { %1203 = vmatprep.subr.bf16.mxu0 %v2801_v51  ;;  %1246 = vmatprep.subr.bf16.mxu1 %v2803_v54 }
  0xc2   :  { %1204 = vmatpush1.bf16.msra.mxu0 %v2800_v55  ;;  %1247 = vmatpush1.bf16.msra.mxu1 %v2802_v57 }
  0xc3   :  { %1205 = vmatprep.subr.bf16.mxu0 %v2817_v58  ;;  %1248 = vmatprep.subr.bf16.mxu1 %v2819_v61 }
  0xc6   :  { %1206 = vmatpush1.bf16.msra.mxu0 %v2816_v63  ;;  %1249 = vmatpush1.bf16.msra.mxu1 %v2818_v1 }
  0xc7   :  { %1207 = vmatprep.subr.bf16.mxu0 %v2833_v2  ;;  %1250 = vmatprep.subr.bf16.mxu1 %v2835_v3 }
  0xca   :  { %1208 = vmatpush1.bf16.msra.mxu0 %v2832_v4  ;;  %1251 = vmatpush1.bf16.msra.mxu1 %v2834_v5 }
  0xcb   :  { %2965 = vmatprep.subr.bf16.mxu0 %v3153_v6  ;;  %2987 = vmatprep.subr.bf16.mxu1 %v3154_v7 }
  0xcd   :  { %1226 = vmatmul.mubr.bf16.vlgmr.msra.gmra.mrb[12].mxu0 %v3281_v13  ;;  %1269 = vmatmul.mubr.bf16.vlgmr.msra.gmra.mrb[12].mxu1 %v3281_v13 }
  0xce   :  { %2966 = vmatpush3.bf16.msra.mxu0 %v3155_v8  ;;  %2988 = vmatpush3.bf16.msra.mxu1 %v3156_v9 }
  0xcf   :  { %2967 = vmatprep.subr.bf16.mxu0 %v3157_v11  ;;  %2989 = vmatprep.subr.bf16.mxu1 %v3158_v12 }
  0xd2   :  { %2968 = vmatpush3.bf16.msra.mxu0 %v3159_v14  ;;  %2990 = vmatpush3.bf16.msra.mxu1 %v3160_v15 }
  0xd3   :  { %2969 = vmatprep.subr.bf16.mxu0 %v3161_v16  ;;  %2991 = vmatprep.subr.bf16.mxu1 %v3162_v17  ;;  %v3187_v16 = vld [vmem:[#allocation8 + $0x100] sm:$0xff]  }
  0xd6   :  { %2970 = vmatpush3.bf16.msra.mxu0 %v3163_v18  ;;  %2992 = vmatpush3.bf16.msra.mxu1 %v3164_v19  ;;  %v3188_v18 = vld [vmem:[#allocation8 + $0x180] sm:$0xff]   ;;  %v3189_v19 = vld [vmem:[#allocation8 + $0x148] sm:$0xff]  }
  0xd7   :  { %2971 = vmatprep.subr.bf16.mxu0 %v3165_v20  ;;  %2993 = vmatprep.subr.bf16.mxu1 %v3166_v21  ;;  %v3190_v20 = vld [vmem:[#allocation8 + $0x1c8] sm:$0xff]  }
  0xd8   :  { %v3191_v21 = vld [vmem:[#allocation8 + $0x108] sm:$0xff]  }
  0xda   :  { %2972 = vmatpush3.bf16.msra.mxu0 %v3167_v22  ;;  %2994 = vmatpush3.bf16.msra.mxu1 %v3168_v23  ;;  %v3192_v22 = vld [vmem:[#allocation8 + $0x188] sm:$0xff]   ;;  %v3193_v23 = vld [vmem:[#allocation8 + $0x150] sm:$0xff]  }
  0xdb   :  { %2973 = vmatprep.subr.bf16.mxu0 %v3169_v24  ;;  %2995 = vmatprep.subr.bf16.mxu1 %v3170_v25  ;;  %v3194_v24 = vld [vmem:[#allocation8 + $0x1d0] sm:$0xff]  }
  0xdc   :  { %v3195_v25 = vld [vmem:[#allocation8 + $0x110] sm:$0xff]  }
  0xde   :  { %2974 = vmatpush3.bf16.msra.mxu0 %v3171_v26  ;;  %2996 = vmatpush3.bf16.msra.mxu1 %v3172_v27  ;;  %v3196_v26 = vld [vmem:[#allocation8 + $0x190] sm:$0xff]   ;;  %v3197_v27 = vld [vmem:[#allocation8 + $0x158] sm:$0xff]  }
  0xdf   :  { %2975 = vmatprep.subr.bf16.mxu0 %v3173_v28  ;;  %2997 = vmatprep.subr.bf16.mxu1 %v3174_v29  ;;  %v3198_v28 = vld [vmem:[#allocation8 + $0x1d8] sm:$0xff]  }
  0xe0   :  { %v3199_v29 = vld [vmem:[#allocation8 + $0x118] sm:$0xff]  }
  0xe2   :  { %2976 = vmatpush3.bf16.msra.mxu0 %v3175_v30  ;;  %2998 = vmatpush3.bf16.msra.mxu1 %v3176_v31  ;;  %v3200_v30 = vld [vmem:[#allocation8 + $0x198] sm:$0xff]   ;;  %v3201_v31 = vld [vmem:[#allocation8 + $0x160] sm:$0xff]  }
  0xe3   :  { %2977 = vmatprep.subr.bf16.mxu0 %v3177_v32  ;;  %2999 = vmatprep.subr.bf16.mxu1 %v3178_v33  ;;  %v3202_v32 = vld [vmem:[#allocation8 + $0x1e0] sm:$0xff]  }
  0xe4   :  { %v3203_v33 = vld [vmem:[#allocation8 + $0x120] sm:$0xff]  }
  0xe6   :  { %2978 = vmatpush3.bf16.msra.mxu0 %v3179_v34  ;;  %3000 = vmatpush3.bf16.msra.mxu1 %v3180_v10  ;;  %v3204_v34 = vld [vmem:[#allocation8 + $0x1a0] sm:$0xff]   ;;  %v3205_v10 = vld [vmem:[#allocation8 + $0x168] sm:$0xff]  }
  0xe7   :  { %2979 = vmatprep.subr.bf16.mxu0 %v3181_v35  ;;  %3001 = vmatprep.subr.bf16.mxu1 %v3182_v36  ;;  %v227_v35 = vsub.s32 4, %v3512_v42  ;;  %v3206_v36 = vld [vmem:[#allocation8 + $0x1e8] sm:$0xff]  }
  0xe9   :  { %v228_v41 = vrot.slane %v3515_v0, %v227_v35 }
  0xea   :  { %2980 = vmatpush3.bf16.msra.mxu0 %v3183_v37  ;;  %3002 = vmatpush3.bf16.msra.mxu1 %v3184_v38  ;;  %v235_v37 = vsub.s32 6, %v3512_v42  ;;  %v231_v38 = vsub.s32 5, %v3512_v42 }
  0xeb   :  { %3009 = vmatprep.subr.bf16.mxu0 %v3185_v39  ;;  %3031 = vmatprep.subr.bf16.mxu1 %v3186_v40  ;;  %v239_v39 = vsub.s32 7, %v3512_v42  ;;  %v3207_v40 = vld [vmem:[#allocation8 + $0x128] sm:$0xff]  }
 0x140   :  { %v969_v51 = vpop.f32.mrb[0].mxu0  ;;  %v1012_v53 = vpop.f32.mrb[0].mxu1 }
 0x141   :  { %v970_v52 = vadd.f32 %v969_v51, %v212_v47  ;;  %v971_v54 = vpop.f32.mrb[1].mxu0  ;;  %v1013_v55 = vadd.f32 %v1012_v53, %v220_v48  ;;  %v1014_v57 = vpop.f32.mrb[1].mxu1  ;;  %v3210_v51 = vld [vmem:[#allocation8 + $0x1f0] sm:$0xff]  }
 0x142   :  { %v972_v56 = vadd.f32 %v971_v54, %v216_v49  ;;  %v973_v58 = vpop.f32.mrb[2].mxu0  ;;  %v1015_v60 = vadd.f32 %v1014_v57, %v224_v50  ;;  %v1016_v62 = vpop.f32.mrb[2].mxu1  ;;  %v3211_v54 = vld [vmem:[#allocation8 + $0x130] sm:$0xff]  }
 0x143   :  { %v1279_v59 = vmax.f32 %v970_v52, 0.0  ;;  %v974_v61 = vadd.f32 %v973_v58, %v212_v47  ;;  %v975_v63 = vpop.f32.mrb[3].mxu0  ;;  %v1281_v1 = vmax.f32 %v1013_v55, 0.0  ;;  %v1017_v2 = vadd.f32 %v1016_v62, %v220_v48  ;;  %v1018_v4 = vpop.f32.mrb[3].mxu1  ;;  %v3208_v47 = vld [vmem:[#allocation8 + $0x1a8] sm:$0xff]   ;;  %v3209_v48 = vld [vmem:[#allocation8 + $0x170] sm:$0xff]  }
 0x144   :  { %v976_v3 = vadd.f32 %v975_v63, %v216_v49  ;;  %v1282_v5 = vmax.f32 %v1015_v60, 0.0  ;;  %v1019_v7 = vadd.f32 %v1018_v4, %v224_v50  ;;  %v1280_v8 = vmax.f32 %v972_v56, 0.0  ;;  %v3212_v58 = vld [vmem:[#allocation8 + $0x1b0] sm:$0xff]  }
 0x145   :  { %v1295_v6 = vmax.f32 %v974_v61, 0.0  ;;  %v1297_v9 = vmax.f32 %v1017_v2, 0.0  ;;  %v236_v49 = vrot.slane %v3515_v0, %v235_v37  ;;  %v232_v50 = vrot.slane %v3515_v0, %v231_v38 }
 0x146   :  { %v1296_v11 = vmax.f32 %v976_v3, 0.0  ;;  %v1298_v13 = vmax.f32 %v1019_v7, 0.0  ;;  %v240_v52 = vrot.slane %v3515_v0, %v239_v39 }
 0x147   :  { %v1311_v12 = vpack.c.bf16 %v1295_v6, %v1279_v59  ;;  %v1313_v14 = vpack.c.bf16 %v1297_v9, %v1281_v1  ;;  %v3213_v59 = vld [vmem:[#allocation8 + $0x178] sm:$0xff]  }
 0x148   :  { %v1312_v15 = vpack.c.bf16 %v1296_v11, %v1280_v8  ;;  %v1314_v17 = vpack.c.bf16 %v1298_v13, %v1282_v5  ;;  %v3214_v1 = vld [vmem:[#allocation8 + $0x1f8] sm:$0xff]  }
 0x149   :  { %v3215_v11 = vld [vmem:[#allocation8 + $0x138] sm:$0xff]  }
 0x14a   :  { %2390 = vmatprep.mubr.bf16.mxu0 %v1312_v15  ;;  %2431 = vmatprep.mubr.bf16.mxu1 %v1314_v17  ;;  %v3216_v15 = vld [vmem:[#allocation8 + $0x1b8] sm:$0xff]  }
 0x14b   :  { %2391 = vmatmul.mubr.bf16.vlgmr.msra.gmra.mrb[16].mxu0 %v1311_v12  ;;  %2432 = vmatmul.mubr.bf16.vlgmr.msra.gmra.mrb[16].mxu1 %v1313_v14 }
 0x14c   :  { %3010 = vmatpush3.bf16.msra.mxu0 %v3187_v16  ;;  %3032 = vmatpush3.bf16.msra.mxu1 %v3188_v18  ;;  %v3217_v16 = vld [vmem:[#allocation8 + $0x240] sm:$0xff]  }
 0x14d   :  { %3011 = vmatprep.subr.bf16.mxu0 %v3189_v19  ;;  %3033 = vmatprep.subr.bf16.mxu1 %v3190_v20  ;;  %v3218_v20 = vld [vmem:[#allocation8 + $0x2c0] sm:$0xff]  }
 0x150   :  { %3012 = vmatpush3.bf16.msra.mxu0 %v3191_v21  ;;  %3034 = vmatpush3.bf16.msra.mxu1 %v3192_v22 }
 0x151   :  { %3013 = vmatprep.subr.bf16.mxu0 %v3193_v23  ;;  %3035 = vmatprep.subr.bf16.mxu1 %v3194_v24 }
 0x154   :  { %3014 = vmatpush3.bf16.msra.mxu0 %v3195_v25  ;;  %3036 = vmatpush3.bf16.msra.mxu1 %v3196_v26  ;;  %v3219_v25 = vld [vmem:[#allocation8 + $0x200] sm:$0xff]  }
 0x155   :  { %3015 = vmatprep.subr.bf16.mxu0 %v3197_v27  ;;  %3037 = vmatprep.subr.bf16.mxu1 %v3198_v28  ;;  %v3220_v27 = vld [vmem:[#allocation8 + $0x280] sm:$0xff]   ;;  %v3221_v28 = vld [vmem:[#allocation8 + $0x248] sm:$0xff]  }
 0x158   :  { %3016 = vmatpush3.bf16.msra.mxu0 %v3199_v29  ;;  %3038 = vmatpush3.bf16.msra.mxu1 %v3200_v30  ;;  %v3222_v29 = vld [vmem:[#allocation8 + $0x2c8] sm:$0xff]  }
 0x159   :  { %3017 = vmatprep.subr.bf16.mxu0 %v3201_v31  ;;  %3039 = vmatprep.subr.bf16.mxu1 %v3202_v32  ;;  %v3223_v30 = vld [vmem:[#allocation8 + $0x208] sm:$0xff]   ;;  %v3225_v32 = vld [vmem:[#allocation8 + $0x250] sm:$0xff]  }
 0x15a   :  { %v3224_v31 = vld [vmem:[#allocation8 + $0x288] sm:$0xff]  }
 0x15c   :  { %3018 = vmatpush3.bf16.msra.mxu0 %v3203_v33  ;;  %3040 = vmatpush3.bf16.msra.mxu1 %v3204_v34  ;;  %v3226_v33 = vld [vmem:[#allocation8 + $0x2d0] sm:$0xff]  }
 0x15d   :  { %3019 = vmatprep.subr.bf16.mxu0 %v3205_v10  ;;  %3041 = vmatprep.subr.bf16.mxu1 %v3206_v36  ;;  %v3227_v34 = vld [vmem:[#allocation8 + $0x210] sm:$0xff]   ;;  %v3229_v36 = vld [vmem:[#allocation8 + $0x258] sm:$0xff]  }
 0x15e   :  { %v3228_v10 = vld [vmem:[#allocation8 + $0x290] sm:$0xff]  }
 0x160   :  { %v1055_v53 = vpop.f32.mrb[4].mxu0  ;;  %3020 = vmatpush3.bf16.msra.mxu0 %v3207_v40  ;;  %v1098_v56 = vpop.f32.mrb[4].mxu1  ;;  %3042 = vmatpush3.bf16.msra.mxu1 %v3208_v47  ;;  %v3230_v40 = vld [vmem:[#allocation8 + $0x2d8] sm:$0xff]  }
 0x161   :  { %v1056_v55 = vadd.f32 %v1055_v53, %v228_v41  ;;  %v1057_v57 = vpop.f32.mrb[5].mxu0  ;;  %3021 = vmatprep.subr.bf16.mxu0 %v3209_v48  ;;  %v1099_v60 = vadd.f32 %v1098_v56, %v236_v49  ;;  %v1100_v62 = vpop.f32.mrb[5].mxu1  ;;  %3043 = vmatprep.subr.bf16.mxu1 %v3210_v51  ;;  %v3232_v47 = vld [vmem:[#allocation8 + $0x298] sm:$0xff]   ;;  %v3233_v48 = vld [vmem:[#allocation8 + $0x260] sm:$0xff]   ;;  %v3238_v53 = vld [vmem:[#allocation8 + $0x2e8] sm:$0xff]  }
 0x162   :  { %v1058_v61 = vadd.f32 %v1057_v57, %v232_v50  ;;  %v1059_v63 = vpop.f32.mrb[6].mxu0  ;;  %v1101_v3 = vadd.f32 %v1100_v62, %v240_v52  ;;  %v1102_v0 = vpop.f32.mrb[6].mxu1  ;;  %v3236_v51 = vld [vmem:[#allocation8 + $0x2a0] sm:$0xff]   ;;  %v3240_v57 = vld [vmem:[#allocation8 + $0x2a8] sm:$0xff]  }
 0x163   :  { %v1283_v2 = vmax.f32 %v1056_v55, 0.0  ;;  %v1060_v4 = vadd.f32 %v1059_v63, %v228_v41  ;;  %v1061_v5 = vpop.f32.mrb[7].mxu0  ;;  %v1285_v6 = vmax.f32 %v1099_v60, 0.0  ;;  %v1103_v7 = vadd.f32 %v1102_v0, %v236_v49  ;;  %v1104_v9 = vpop.f32.mrb[7].mxu1  ;;  %v3231_v41 = vld [vmem:[#allocation8 + $0x218] sm:$0xff]   ;;  %v3234_v49 = vld [vmem:[#allocation8 + $0x2e0] sm:$0xff]  }
 0x164   :  { %v1062_v8 = vadd.f32 %v1061_v5, %v232_v50  ;;  %3022 = vmatpush3.bf16.msra.mxu0 %v3211_v54  ;;  %v1286_v12 = vmax.f32 %v1101_v3, 0.0  ;;  %v1105_v14 = vadd.f32 %v1104_v9, %v240_v52  ;;  %3044 = vmatpush3.bf16.msra.mxu1 %v3212_v58  ;;  %v1284_v17 = vmax.f32 %v1058_v61, 0.0  ;;  %v3235_v50 = vld [vmem:[#allocation8 + $0x220] sm:$0xff]   ;;  %v3237_v52 = vld [vmem:[#allocation8 + $0x268] sm:$0xff]   ;;  %v3548_v54 = vld [vmem:[#allocation7 + $0x8] sm:$0xff] }
 0x165   :  { %v1299_v13 = vmax.f32 %v1060_v4, 0.0  ;;  %3023 = vmatprep.subr.bf16.mxu0 %v3213_v59  ;;  %v1301_v18 = vmax.f32 %v1103_v7, 0.0  ;;  %3045 = vmatprep.subr.bf16.mxu1 %v3214_v1  ;;  %v3239_v55 = vld [vmem:[#allocation8 + $0x228] sm:$0xff]   ;;  %v244_v56 = vrot.slane %v3548_v54, %v211_v43  ;;  %v3241_v58 = vld [vmem:[#allocation8 + $0x270] sm:$0xff]   ;;  %v252_v59 = vrot.slane %v3548_v54, %v219_v44  ;;  %v3245_v0 = vld [vmem:[#allocation8 + $0x278] sm:$0xff]  }
 0x166   :  { %v1300_v19 = vmax.f32 %v1062_v8, 0.0  ;;  %v1302_v22 = vmax.f32 %v1105_v14, 0.0  ;;  %v248_v60 = vrot.slane %v3548_v54, %v215_v45  ;;  %v3242_v61 = vld [vmem:[#allocation8 + $0x2f0] sm:$0xff]   ;;  %v256_v62 = vrot.slane %v3548_v54, %v223_v46  ;;  %v3246_v45 = vld [vmem:[#allocation8 + $0x2f8] sm:$0xff]  }
 0x167   :  { %v1315_v21 = vpack.c.bf16 %v1299_v13, %v1283_v2  ;;  %v1317_v23 = vpack.c.bf16 %v1301_v18, %v1285_v6  ;;  %v3243_v1 = vld [vmem:[#allocation8 + $0x230] sm:$0xff]  }
 0x168   :  { %v1316_v24 = vpack.c.bf16 %v1300_v19, %v1284_v17  ;;  %3024 = vmatpush3.bf16.msra.mxu0 %v3215_v11  ;;  %v1318_v26 = vpack.c.bf16 %v1302_v22, %v1286_v12  ;;  %3046 = vmatpush3.bf16.msra.mxu1 %v3216_v15  ;;  %v3244_v4 = vld [vmem:[#allocation8 + $0x2b0] sm:$0xff]   ;;  %v3247_v17 = vld [vmem:[#allocation8 + $0x238] sm:$0xff]   ;;  %v3249_v22 = vld [vmem:[#allocation8 + $0x340] sm:$0xff]  }
 0x169   :  { %3053 = vmatprep.subr.bf16.mxu0 %v3217_v16  ;;  %3075 = vmatprep.subr.bf16.mxu1 %v3218_v20 }
 0x16a   :  { %2472 = vmatprep.mubr.bf16.mxu0 %v1316_v24  ;;  %2513 = vmatprep.mubr.bf16.mxu1 %v1318_v26  ;;  %v3250_v26 = vld [vmem:[#allocation8 + $0x3c0] sm:$0xff]  }
 0x16b   :  { %2473 = vmatmul.mubr.bf16.vlgmr.msra.gmra.mrb[20].mxu0 %v1315_v21  ;;  %2514 = vmatmul.mubr.bf16.vlgmr.msra.gmra.mrb[20].mxu1 %v1317_v23  ;;  %v3248_v21 = vld [vmem:[#allocation8 + $0x2b8] sm:$0xff]  }
 0x16c   :  { %3054 = vmatpush3.bf16.msra.mxu0 %v3219_v25  ;;  %3076 = vmatpush3.bf16.msra.mxu1 %v3220_v27 }
 0x16d   :  { %3055 = vmatprep.subr.bf16.mxu0 %v3221_v28  ;;  %3077 = vmatprep.subr.bf16.mxu1 %v3222_v29 }
 0x170   :  { %3056 = vmatpush3.bf16.msra.mxu0 %v3223_v30  ;;  %3078 = vmatpush3.bf16.msra.mxu1 %v3224_v31  ;;  %v3251_v31 = vld [vmem:[#allocation8 + $0x300] sm:$0xff]  }
 0x171   :  { %3057 = vmatprep.subr.bf16.mxu0 %v3225_v32  ;;  %3079 = vmatprep.subr.bf16.mxu1 %v3226_v33  ;;  %v3252_v33 = vld [vmem:[#allocation8 + $0x380] sm:$0xff]  }
 0x174   :  { %3058 = vmatpush3.bf16.msra.mxu0 %v3227_v34  ;;  %3080 = vmatpush3.bf16.msra.mxu1 %v3228_v10  ;;  %v3253_v34 = vld [vmem:[#allocation8 + $0x348] sm:$0xff]  }
 0x175   :  { %3059 = vmatprep.subr.bf16.mxu0 %v3229_v36  ;;  %3081 = vmatprep.subr.bf16.mxu1 %v3230_v40  ;;  %v3254_v10 = vld [vmem:[#allocation8 + $0x3c8] sm:$0xff]  }
 0x176   :  { %v3255_v36 = vld [vmem:[#allocation8 + $0x308] sm:$0xff]  }
 0x177   :  { %v3256_v40 = vld [vmem:[#allocation8 + $0x388] sm:$0xff]  }
 0x178   :  { %3060 = vmatpush3.bf16.msra.mxu0 %v3231_v41  ;;  %3082 = vmatpush3.bf16.msra.mxu1 %v3232_v47  ;;  %v3257_v41 = vld [vmem:[#allocation8 + $0x350] sm:$0xff]  }
 0x179   :  { %3061 = vmatprep.subr.bf16.mxu0 %v3233_v48  ;;  %3083 = vmatprep.subr.bf16.mxu1 %v3234_v49  ;;  %v3258_v47 = vld [vmem:[#allocation8 + $0x3d0] sm:$0xff]  }
 0x17a   :  { %v3259_v48 = vld [vmem:[#allocation8 + $0x310] sm:$0xff]  }
 0x17b   :  { %v3260_v49 = vld [vmem:[#allocation8 + $0x390] sm:$0xff]  }
 0x17c   :  { %3062 = vmatpush3.bf16.msra.mxu0 %v3235_v50  ;;  %3084 = vmatpush3.bf16.msra.mxu1 %v3236_v51  ;;  %v3261_v50 = vld [vmem:[#allocation8 + $0x358] sm:$0xff]  }
 0x17d   :  { %3063 = vmatprep.subr.bf16.mxu0 %v3237_v52  ;;  %3085 = vmatprep.subr.bf16.mxu1 %v3238_v53  ;;  %v3262_v51 = vld [vmem:[#allocation8 + $0x3d8] sm:$0xff]  }
 0x17e   :  { %v3263_v52 = vld [vmem:[#allocation8 + $0x318] sm:$0xff]  }
 0x17f   :  { %v3264_v53 = vld [vmem:[#allocation8 + $0x398] sm:$0xff]  }
 0x180   :  { %v1141_v63 = vpop.f32.mrb[8].mxu0  ;;  %3064 = vmatpush3.bf16.msra.mxu0 %v3239_v55  ;;  %v1184_v2 = vpop.f32.mrb[8].mxu1  ;;  %3086 = vmatpush3.bf16.msra.mxu1 %v3240_v57  ;;  %v3265_v55 = vld [vmem:[#allocation8 + $0x360] sm:$0xff]  }
 0x181   :  { %v1142_v43 = vadd.f32 %v1141_v63, %v244_v56  ;;  %v1143_v3 = vpop.f32.mrb[9].mxu0  ;;  %3065 = vmatprep.subr.bf16.mxu0 %v3241_v58  ;;  %v1185_v44 = vadd.f32 %v1184_v2, %v252_v59  ;;  %v1186_v6 = vpop.f32.mrb[9].mxu1  ;;  %3087 = vmatprep.subr.bf16.mxu1 %v3242_v61  ;;  %v3267_v57 = vld [vmem:[#allocation8 + $0x320] sm:$0xff]   ;;  %v3271_v61 = vld [vmem:[#allocation8 + $0x328] sm:$0xff]   ;;  %v264_v2 = vrot.slane %v3548_v54, %v231_v38  ;;  %v3278_v38 = vld [vmem:[#allocation8 + $0x3f8] sm:$0xff]  }
 0x182   :  { %v1144_v5 = vadd.f32 %v1143_v3, %v248_v60  ;;  %v1145_v7 = vpop.f32.mrb[10].mxu0  ;;  %v1187_v9 = vadd.f32 %v1186_v6, %v256_v62  ;;  %v1188_v46 = vpop.f32.mrb[10].mxu1  ;;  %v3268_v58 = vld [vmem:[#allocation8 + $0x3a0] sm:$0xff]   ;;  %v3272_v63 = vld [vmem:[#allocation8 + $0x3a8] sm:$0xff]   ;;  %v3274_v3 = vld [vmem:[#allocation8 + $0x3f0] sm:$0xff]  }
 0x183   :  { %v1287_v8 = vmax.f32 %v1142_v43, 0.0  ;;  %v1146_v11 = vadd.f32 %v1145_v7, %v244_v56  ;;  %v1147_v12 = vpop.f32.mrb[11].mxu0  ;;  %v1289_v13 = vmax.f32 %v1185_v44, 0.0  ;;  %v1189_v14 = vadd.f32 %v1188_v46, %v252_v59  ;;  %v1190_v16 = vpop.f32.mrb[11].mxu1  ;;  %v3266_v56 = vld [vmem:[#allocation8 + $0x3e0] sm:$0xff]   ;;  %v3269_v59 = vld [vmem:[#allocation8 + $0x368] sm:$0xff]  }
 0x184   :  { %v1148_v15 = vadd.f32 %v1147_v12, %v248_v60  ;;  %3066 = vmatpush3.bf16.msra.mxu0 %v3243_v1  ;;  %v1290_v18 = vmax.f32 %v1187_v9, 0.0  ;;  %v1191_v20 = vadd.f32 %v1190_v16, %v256_v62  ;;  %3088 = vmatpush3.bf16.msra.mxu1 %v3244_v4  ;;  %v1288_v23 = vmax.f32 %v1144_v5, 0.0  ;;  %v3270_v60 = vld [vmem:[#allocation8 + $0x3e8] sm:$0xff]   ;;  %v3273_v1 = vld [vmem:[#allocation8 + $0x370] sm:$0xff]   ;;  %v3279_v16 = vld [vmem:[#allocation8 + $0x338] sm:$0xff]  }
 0x185   :  { %v1303_v19 = vmax.f32 %v1146_v11, 0.0  ;;  %3067 = vmatprep.subr.bf16.mxu0 %v3245_v0  ;;  %v1305_v24 = vmax.f32 %v1189_v14, 0.0  ;;  %3089 = vmatprep.subr.bf16.mxu1 %v3246_v45  ;;  %v260_v62 = vrot.slane %v3548_v54, %v227_v35  ;;  %v268_v43 = vrot.slane %v3548_v54, %v235_v37  ;;  %v3275_v44 = vld [vmem:[#allocation8 + $0x330] sm:$0xff]   ;;  %v3277_v45 = vld [vmem:[#allocation8 + $0x378] sm:$0xff]  }
 0x186   :  { %v1304_v25 = vmax.f32 %v1148_v15, 0.0  ;;  %v1306_v28 = vmax.f32 %v1191_v20, 0.0  ;;  %v272_v4 = vrot.slane %v3548_v54, %v239_v39  ;;  %v3276_v7 = vld [vmem:[#allocation8 + $0x3b0] sm:$0xff]  }
 0x187   :  { %v1319_v27 = vpack.c.bf16 %v1303_v19, %v1287_v8  ;;  %v1321_v29 = vpack.c.bf16 %v1305_v24, %v1289_v13 }
 0x188   :  { %v1320_v30 = vpack.c.bf16 %v1304_v25, %v1288_v23  ;;  %3068 = vmatpush3.bf16.msra.mxu0 %v3247_v17  ;;  %v1322_v32 = vpack.c.bf16 %v1306_v28, %v1290_v18  ;;  %3090 = vmatpush3.bf16.msra.mxu1 %v3248_v21  ;;  %v3280_v21 = vld [vmem:[#allocation8 + $0x3b8] sm:$0xff]  }
 0x189   :  { %3097 = vmatprep.subr.bf16.mxu0 %v3249_v22  ;;  %3119 = vmatprep.subr.bf16.mxu1 %v3250_v26 }
 0x18a   :  { %2554 = vmatprep.mubr.bf16.mxu0 %v1320_v30  ;;  %2595 = vmatprep.mubr.bf16.mxu1 %v1322_v32  ;;  %v2836_v32 = vld [vmem:[%s3593_s4] ss:$0 sm:$0xff]  ;;  %s3408_s4 = smov [#allocation10]  }
 0x18b   :  { %2555 = vmatmul.mubr.bf16.vlgmr.msra.gmra.mrb[24].mxu0 %v1319_v27  ;;  %2596 = vmatmul.mubr.bf16.vlgmr.msra.gmra.mrb[24].mxu1 %v1321_v29  ;;  %s2693_s1 = sshll.u32 %s3408_s4, 4  ;;  %s2694_s1 = int_to_ptr.vmem [resolvable:$true] %s2693_s1 }
 0x18c   :  { %3098 = vmatpush3.bf16.msra.mxu0 %v3251_v31  ;;  %3120 = vmatpush3.bf16.msra.mxu1 %v3252_v33  ;;  %s3370_s17 = scalar_lea.vmem %s2694_s1, 256  ;;  %p3375_p5 = scmp.lt.s32.totalorder %s2694_s1, %s2694_s1 }
 0x18d   :  { %3099 = vmatprep.subr.bf16.mxu0 %v3253_v34  ;;  %3121 = vmatprep.subr.bf16.mxu1 %v3254_v10  ;;  %p3371_p4 = scmp.ne.s32.totalorder %s2694_s1, %s3370_s17  ;;  %p3376_p6 = scmp.lt.s32.totalorder %s3370_s17, %s3370_s17 }
 0x18f   :  { %p3377_p7 = por %p3376_p6, %p3375_p5 }
 0x190   :  { %3100 = vmatpush3.bf16.msra.mxu0 %v3255_v36  ;;  %3122 = vmatpush3.bf16.msra.mxu1 %v3256_v40 }
 0x191   :  { %3101 = vmatprep.subr.bf16.mxu0 %v3257_v41  ;;  %3123 = vmatprep.subr.bf16.mxu1 %v3258_v47  ;;  %p3378_p8 = pnand %p3377_p7, %p3371_p4 }
 0x194   :  { %3102 = vmatpush3.bf16.msra.mxu0 %v3259_v48  ;;  %3124 = vmatpush3.bf16.msra.mxu1 %v3260_v49 }
 0x195   :  { %3103 = vmatprep.subr.bf16.mxu0 %v3261_v50  ;;  %3125 = vmatprep.subr.bf16.mxu1 %v3262_v51 }
 0x198   :  { %3104 = vmatpush3.bf16.msra.mxu0 %v3263_v52  ;;  %3126 = vmatpush3.bf16.msra.mxu1 %v3264_v53 }
 0x199   :  { %3105 = vmatprep.subr.bf16.mxu0 %v3265_v55  ;;  %3127 = vmatprep.subr.bf16.mxu1 %v3266_v56 }
 0x19c   :  { %3106 = vmatpush3.bf16.msra.mxu0 %v3267_v57  ;;  %3128 = vmatpush3.bf16.msra.mxu1 %v3268_v58 }
 0x19d   :  { %3107 = vmatprep.subr.bf16.mxu0 %v3269_v59  ;;  %3129 = vmatprep.subr.bf16.mxu1 %v3270_v60 }
 0x1a0   :  { %v1227_v0 = vpop.f32.mrb[12].mxu0  ;;  %3108 = vmatpush3.bf16.msra.mxu0 %v3271_v61  ;;  %v1270_v5 = vpop.f32.mrb[12].mxu1  ;;  %3130 = vmatpush3.bf16.msra.mxu1 %v3272_v63 }
 0x1a1   :  { %v1228_v35 = vadd.f32 %v1227_v0, %v260_v62  ;;  %v1229_v6 = vpop.f32.mrb[13].mxu0  ;;  %3109 = vmatprep.subr.bf16.mxu0 %v3273_v1  ;;  %v1271_v37 = vadd.f32 %v1270_v5, %v268_v43  ;;  %v1272_v9 = vpop.f32.mrb[13].mxu1  ;;  %3131 = vmatprep.subr.bf16.mxu1 %v3274_v3 }
 0x1a2   :  { %v1230_v8 = vadd.f32 %v1229_v6, %v264_v2  ;;  %v1231_v11 = vpop.f32.mrb[14].mxu0  ;;  %v1273_v46 = vadd.f32 %v1272_v9, %v272_v4  ;;  %v1274_v12 = vpop.f32.mrb[14].mxu1 }
 0x1a3   :  { %v1232_v42 = vadd.f32 %v1231_v11, %v260_v62  ;;  %v1233_v39 = vpop.f32.mrb[15].mxu0  ;;  %v1293_v54 = vmax.f32 %v1271_v37, 0.0  ;;  %v1275_v13 = vadd.f32 %v1274_v12, %v268_v43  ;;  %v1276_v15 = vpop.f32.mrb[15].mxu1  ;;  %v1291_v17 = vmax.f32 %v1228_v35, 0.0 }
 0x1a4   :  { %v1234_v14 = vadd.f32 %v1233_v39, %v264_v2  ;;  %3110 = vmatpush3.bf16.msra.mxu0 %v3275_v44  ;;  %v1294_v18 = vmax.f32 %v1273_v46, 0.0  ;;  %v1277_v20 = vadd.f32 %v1276_v15, %v272_v4  ;;  %3132 = vmatpush3.bf16.msra.mxu1 %v3276_v7  ;;  %v1292_v22 = vmax.f32 %v1230_v8, 0.0 }
 0x1a5   :  { %v1307_v19 = vmax.f32 %v1232_v42, 0.0  ;;  %3111 = vmatprep.subr.bf16.mxu0 %v3277_v45  ;;  %v1309_v23 = vmax.f32 %v1275_v13, 0.0  ;;  %3133 = vmatprep.subr.bf16.mxu1 %v3278_v38 }
 0x1a6   :  { %v1308_v24 = vmax.f32 %v1234_v14, 0.0  ;;  %v1310_v26 = vmax.f32 %v1277_v20, 0.0 }
 0x1a7   :  { %v1323_v25 = vpack.c.bf16 %v1307_v19, %v1291_v17  ;;  %v1325_v27 = vpack.c.bf16 %v1309_v23, %v1293_v54 }
 0x1a8   :  { %v1324_v28 = vpack.c.bf16 %v1308_v24, %v1292_v22  ;;  %3112 = vmatpush3.bf16.msra.mxu0 %v3279_v16  ;;  %v1326_v29 = vpack.c.bf16 %v1310_v26, %v1294_v18  ;;  %3134 = vmatpush3.bf16.msra.mxu1 %v3280_v21 }
 0x1aa   :  { %2636 = vmatprep.mubr.bf16.mxu0 %v1324_v28  ;;  %2677 = vmatprep.mubr.bf16.mxu1 %v1326_v29 }
 0x1ab   :  { %2637 = vmatmul.mubr.bf16.vlgmr.msra.gmra.mrb[28].mxu0 %v1323_v25  ;;  %2678 = vmatmul.mubr.bf16.vlgmr.msra.gmra.mrb[28].mxu1 %v1325_v27 }
 0x21e   :  { %v2981_v30 = vpop.f32.mrb[16].mxu0  ;;  %v3003_v31 = vpop.f32.mrb[16].mxu1 }
 0x21f   :  { %v2982_v33 = vpop.f32.mrb[17].mxu0  ;;  %v3004_v10 = vpop.f32.mrb[17].mxu1 }
 0x220   :  { %v2983_v34 = vadd.f32 %v2982_v33, %v2981_v30  ;;  %v2984_v36 = vpop.f32.mrb[18].mxu0  ;;  %v3005_v40 = vadd.f32 %v3004_v10, %v3003_v31  ;;  %v3006_v41 = vpop.f32.mrb[18].mxu1 }
 0x221   :  { %v2985_v47 = vpop.f32.mrb[19].mxu0  ;;  %v3007_v50 = vpop.f32.mrb[19].mxu1 }
 0x222   :  { %v2393_v48 = vadd.f32 %v2983_v34, %v2836_v32  ;;  %v2986_v49 = vadd.f32 %v2985_v47, %v2984_v36  ;;  %v3008_v51 = vadd.f32 %v3007_v50, %v3006_v41 }
 0x224   :  { %v2434_v52 = vadd.f32 %v3005_v40, %v2393_v48  ;;  %v2396_v53 = vadd.f32 %v2986_v49, %v2836_v32 }
 0x226   :  { %v2437_v55 = vadd.f32 %v3008_v51, %v2396_v53 }
 0x23e   :  { %v3025_v56 = vpop.f32.mrb[20].mxu0  ;;  %v3047_v57 = vpop.f32.mrb[20].mxu1 }
 0x23f   :  { %v3026_v58 = vpop.f32.mrb[21].mxu0  ;;  %v3048_v60 = vpop.f32.mrb[21].mxu1 }
 0x240   :  { %v3027_v59 = vadd.f32 %v3026_v58, %v3025_v56  ;;  %v3028_v61 = vpop.f32.mrb[22].mxu0  ;;  %v3049_v62 = vadd.f32 %v3048_v60, %v3047_v57  ;;  %v3050_v63 = vpop.f32.mrb[22].mxu1 }
 0x241   :  { %v3029_v1 = vpop.f32.mrb[23].mxu0  ;;  %v3051_v3 = vpop.f32.mrb[23].mxu1 }
 0x242   :  { %v2475_v43 = vadd.f32 %v3027_v59, %v2434_v52  ;;  %v3030_v2 = vadd.f32 %v3029_v1, %v3028_v61  ;;  %v3052_v4 = vadd.f32 %v3051_v3, %v3050_v63 }
 0x244   :  { %v2516_v0 = vadd.f32 %v3049_v62, %v2475_v43  ;;  %v2478_v44 = vadd.f32 %v3030_v2, %v2437_v55 }
 0x246   :  { %v2519_v35 = vadd.f32 %v3052_v4, %v2478_v44 }
 0x25e   :  { %v3069_v5 = vpop.f32.mrb[24].mxu0  ;;  %v3091_v6 = vpop.f32.mrb[24].mxu1 }
 0x25f   :  { %v3070_v7 = vpop.f32.mrb[25].mxu0  ;;  %v3092_v37 = vpop.f32.mrb[25].mxu1 }
 0x260   :  { %v3071_v45 = vadd.f32 %v3070_v7, %v3069_v5  ;;  %v3072_v8 = vpop.f32.mrb[26].mxu0  ;;  %v3093_v9 = vadd.f32 %v3092_v37, %v3091_v6  ;;  %v3094_v11 = vpop.f32.mrb[26].mxu1 }
 0x261   :  { %v3073_v38 = vpop.f32.mrb[27].mxu0  ;;  %v3095_v12 = vpop.f32.mrb[27].mxu1 }
 0x262   :  { %v2557_v46 = vadd.f32 %v3071_v45, %v2516_v0  ;;  %v3074_v42 = vadd.f32 %v3073_v38, %v3072_v8  ;;  %v3096_v39 = vadd.f32 %v3095_v12, %v3094_v11 }
 0x264   :  { %v2598_v54 = vadd.f32 %v3093_v9, %v2557_v46  ;;  %v2560_v13 = vadd.f32 %v3074_v42, %v2519_v35 }
 0x266   :  { %v2601_v14 = vadd.f32 %v3096_v39, %v2560_v13 }
 0x27e   :  { %v3113_v15 = vpop.f32.mrb[28].mxu0  ;;  %v3135_v16 = vpop.f32.mrb[28].mxu1 }
 0x27f   :  { %v3114_v17 = vpop.f32.mrb[29].mxu0  ;;  %v3136_v19 = vpop.f32.mrb[29].mxu1 }
 0x280   :  { %v3115_v18 = vadd.f32 %v3114_v17, %v3113_v15  ;;  %v3116_v20 = vpop.f32.mrb[30].mxu0  ;;  %v3137_v21 = vadd.f32 %v3136_v19, %v3135_v16  ;;  %v3138_v22 = vpop.f32.mrb[30].mxu1 }
 0x281   :  { %v3117_v23 = vpop.f32.mrb[31].mxu0  ;;  %v3139_v26 = vpop.f32.mrb[31].mxu1 }
 0x282   :  { %v2639_v24 = vadd.f32 %v3115_v18, %v2598_v54  ;;  %v3118_v25 = vadd.f32 %v3117_v23, %v3116_v20  ;;  %v3140_v27 = vadd.f32 %v3139_v26, %v3138_v22 }
 0x284   :  { %v2680_v28 = vadd.f32 %v3137_v21, %v2639_v24  ;;  %v2642_v29 = vadd.f32 %v3118_v25, %v2601_v14 }
 0x286   :  { %2686 = vst [vmem:[#allocation10] sm:$0xff] %v2680_v28  ;;  %v2683_v30 = vadd.f32 %v3140_v27, %v2642_v29 }
 0x288   :  { %2687 = vst [vmem:[#allocation10 + $0x8] sm:$0xff] %v2683_v30 }
 0x289   :  { %3381 = shalt.err (!%p3378_p8)
}
 0x28a   :  { %s3382_s20 = scalar_lea.hbm %s3594_s5, 256 }
 0x28b   :  { %p3383_p9 = scmp.ne.s32.totalorder %s3594_s5, %s3382_s20  ;;  %p3386_p10 = scmp.lt.u32.totalorder %s3382_s20, %s3594_s5 }
 0x28d   :  { %p3388_p11 = pnand %p3386_p10, %p3383_p9 }
 0x28f   :  { %3391 = shalt.err (!%p3388_p11)
}
 0x290   :  { %s3409_s25 = smov 128   ;;  %s3410_s26 = smov 8  }
 0x291   :  { %2699 = dma.vmem_to_hbm [thread:$0]  %s2694_s1, 256, %s3594_s5, [#allocation4], %s3409_s25, %s3409_s25, %s3410_s26  }
 0x292   :  { %3398 = dma.done.wait [#allocation4], 256  }
 0x293   :  { %3399 = vsyncadd [#allocation4], 4294967040 }
 0x294   :  { %2703 = vsyncpa [#allocation3], 1 }
 0x295   :  { %2704 = vsyncpa [#allocation6], 1 }
 0x296   :  { %2705 = vsyncpa [#allocation9], 1 }
 0x297   :  { %2706 = vsyncpa [#allocation4], 1 }

</bundles_post_ra>
